<compile_context>
chip_gen: v7x
topology: tpu7x:2x2x1
jax: 0.10.0
libtpu: 0.0.40
codegen_flags: <defaults>
</compile_context>

<pallas_src>
import math

import jax
import jax.numpy as jnp
import numpy as np
from jax.experimental import pallas as pl
from jax.experimental.pallas import tpu as pltpu

# ---- small, module-consistent sizes -------------------------------------
N = 1              # RPN in Pipeline1 processes one image (batch_idx = [[0]])
C = 128            # RPN head hidden channels (256 in the real model, scaled)
H = W = 16         # spatial size of one FPN level
HW = H * W
A = 3              # anchors per location (3 aspect ratios, 1 scale per level)
K = HW * A         # anchors per level
OUT_PAD = 16       # packed head rows: cls(3) | dx(3) | dy(3) | dw(3) | dh(3) | pad(1)
TN = 128           # lane tile over H*W  -> grid = (HW // TN,)

BBOX_XFORM_CLIP = math.log(1000.0 / 16.0)   # torchvision BoxCoder clamp


# ============== Pallas kernel: fused RPN head + box decode ================
# conv3x3(C->C) as one im2col matmul (C, 9C) @ (9C, TN)  +bias +ReLU,
# then packed 1x1 heads (16, C) @ (C, TN), then BoxCoder decode + sigmoid,
# written as one (16, TN) lane-dense store.
def fused_rpn_kernel(x_ref, wconv_ref, bconv_ref, whead_ref, bhead_ref,
                     anc_ref, out_ref):
    # conv: bf16 operands, f32 accumulation on the MXU
    t = jnp.dot(wconv_ref[...], x_ref[...],
                preferred_element_type=jnp.float32)          # (C, TN) f32
    t = jnp.maximum(t + bconv_ref[...], 0.0)                 # bias + ReLU (f32)

    # packed cls/bbox heads
    o = jnp.dot(whead_ref[...], t.astype(jnp.bfloat16),
                preferred_element_type=jnp.float32) + bhead_ref[...]  # (16, TN)

    logits = o[0:A, :]                                       # (A, TN)
    dx = o[A:2 * A, :]
    dy = o[2 * A:3 * A, :]
    dw = jnp.minimum(o[3 * A:4 * A, :], BBOX_XFORM_CLIP)
    dh = jnp.minimum(o[4 * A:5 * A, :], BBOX_XFORM_CLIP)

    anc = anc_ref[...]                                       # (4, A, TN) f32
    x1, y1, x2, y2 = anc[0], anc[1], anc[2], anc[3]
    w = x2 - x1
    h = y2 - y1
    cx = x1 + 0.5 * w
    cy = y1 + 0.5 * h
    pcx = dx * w + cx
    pcy = dy * h + cy
    pw = jnp.exp(dw) * w
    ph = jnp.exp(dh) * h

    probs = jax.nn.sigmoid(logits)                           # (A, TN)
    pad = jnp.zeros_like(probs[:1])                          # (1, TN)
    # one combined, lane-dense, sublane-full store
    out_ref[...] = jnp.concatenate(
        [probs,
         pcx - 0.5 * pw, pcy - 0.5 * ph,
         pcx + 0.5 * pw, pcy + 0.5 * ph,
         pad], axis=0)                                       # (16, TN)


# ======================= one-time parameter packing =======================
def pack_params(w3, b3, wc, bc, wb, bb):
    """Hoisted out of the per-call path: repack conv/head weights once."""
    # conv weight: OIHW -> (C_out, 9*C_in) matching im2col row order k*C + ci
    w_conv = jnp.transpose(w3, (0, 2, 3, 1)).reshape(C, 9 * C).astype(jnp.bfloat16)
    b_conv = b3.reshape(C, 1).astype(jnp.float32)

    wc2 = wc[:, :, 0, 0]            # (A, C)   cls_logits
    wb2 = wb[:, :, 0, 0]            # (4A, C)  bbox_pred, channel = a*4 + c
    # reorder bbox rows from (a, c) to coordinate-major (c, a)
    idx = np.array([a * 4 + c for c in range(4) for a in range(A)])
    wb_cm = wb2[idx]
    bb_cm = bb[idx]

    w_head = jnp.zeros((OUT_PAD, C), jnp.float32)
    w_head = w_head.at[:A].set(wc2).at[A:5 * A].set(wb_cm)
    b_head = jnp.zeros((OUT_PAD, 1), jnp.float32)
    b_head = b_head.at[:A, 0].set(bc).at[A:5 * A, 0].set(bb_cm)
    return w_conv, b_conv, w_head.astype(jnp.bfloat16), b_head


def grid_anchors_packed(level):
    """AnchorGenerator.grid_anchors for one level, repacked to (4, A, H*W).

    Note: the real FPN uses a different grid size / stride per level; here a
    single 16x16 level is modeled (stride = 800 // H), matching rpn_parallel.
    """
    size = 32.0 * (2 ** level)
    stride = 800 // H
    ratios = jnp.array([0.5, 1.0, 2.0], jnp.float32)
    h_r = jnp.sqrt(ratios)
    w_r = 1.0 / h_r
    ws = (w_r * size) / 2.0
    hs = (h_r * size) / 2.0
    base = jnp.round(jnp.stack([-ws, -hs, ws, hs], axis=1))          # (A, 4)
    sx = jnp.arange(W, dtype=jnp.float32) * stride
    sy = jnp.arange(H, dtype=jnp.float32) * stride
    shift_y, shift_x = jnp.meshgrid(sy, sx, indexing="ij")
    shifts = jnp.stack([shift_x.reshape(-1), shift_y.reshape(-1),
                        shift_x.reshape(-1), shift_y.reshape(-1)], axis=1)
    anchors = shifts[:, None, :] + base[None, :, :]                  # (HW, A, 4)
    return jnp.transpose(anchors, (2, 1, 0))                         # (4, A, HW)


# ============================ kernel wrapper ==============================
def _im2col_cmajor(feature_nchw):
    """(1, C, H, W) f32 -> (9*C, H*W) bf16, tap-major / channel-minor rows."""
    x = feature_nchw[0].astype(jnp.bfloat16)                 # (C, H, W)
    xp = jnp.pad(x, ((0, 0), (1, 1), (1, 1)))                # (C, H+2, W+2)
    cols = [xp[:, ky:ky + H, kx:kx + W].reshape(C, HW)
            for ky in range(3) for kx in range(3)]
    return jnp.concatenate(cols, axis=0)                     # (9C, HW)


@jax.jit
def fused_rpn_forward(feature_nchw, w_conv, b_conv, w_head, b_head, anchors_cap):
    """Returns objectness probs (K,) and decoded proposals (K, 4)."""
    x_cols = _im2col_cmajor(feature_nchw)

    out = pl.pallas_call(
        fused_rpn_kernel,
        grid=(HW // TN,),
        in_specs=[
            pl.BlockSpec((9 * C, TN), lambda j: (0, j)),       # im2col slab
            pl.BlockSpec((C, 9 * C), lambda j: (0, 0)),        # conv weight
            pl.BlockSpec((C, 1), lambda j: (0, 0)),            # conv bias
            pl.BlockSpec((OUT_PAD, C), lambda j: (0, 0)),      # packed head W
            pl.BlockSpec((OUT_PAD, 1), lambda j: (0, 0)),      # packed head b
            pl.BlockSpec((4, A, TN), lambda j: (0, 0, j)),     # anchors
        ],
        out_specs=pl.BlockSpec((OUT_PAD, TN), lambda j: (0, j)),
        out_shape=jax.ShapeDtypeStruct((OUT_PAD, HW), jnp.float32),
        compiler_params=pltpu.CompilerParams(
            dimension_semantics=("parallel",)),
    )(x_cols, w_conv, b_conv, w_head, b_head, anchors_cap)

    # unpack: rows 0..2 = sigmoid(cls), rows 3..14 = box coords (c, a) major.
    probs = out[:A].reshape(-1)                                       # (K,)
    boxes = jnp.transpose(out[A:5 * A].reshape(4, A, HW),
                          (1, 2, 0)).reshape(-1, 4)                   # (K, 4)
    return probs, boxes
    # TODO(synk): at real FPN sizes (C=256, up to ~200x200 maps) tile rows with
    # a halo'd BlockSpec instead of whole-array blocks to fit the VMEM budget.


def rpn_parallel(feature_nchw, packed_params, anchors_cap, level):
    """Pipeline1.rpn_parallel for one FPN level (Pallas hot path + glue)."""
    probs, proposals = fused_rpn_forward(feature_nchw, *packed_params,
                                         anchors_cap)
    # _get_top_n_idx equivalent (pre-NMS top-n on this level); sigmoid is
    # monotone so ranking on probs == ranking on logits.
    top_n = min(256, K)
    top_scores, top_idx = jax.lax.top_k(probs, top_n)
    top_boxes = proposals[top_idx]
    levels = jnp.full((top_n,), level, dtype=jnp.int32)
    # TODO(synk): clip_boxes_to_image / remove_small_boxes / batched_nms,
    # ROIAlign box pooling, box_head/box_predictor, postprocess_detections and
    # the pretrained ResNet50 backbone + FPN + transform are checkpoint-backed
    # / data-dependent library stages and are not translated to Pallas.
    return top_scores, levels, top_boxes


# ============================ pure-JAX reference ==========================
def reference_fused(feature, params, anchors_cap):
    w3, b3, wc, bc, wb, bb = params
    dn = ("NCHW", "OIHW", "NCHW")
    t = jax.lax.conv_general_dilated(feature, w3, (1, 1), "SAME",
                                     dimension_numbers=dn)
    t = jnp.maximum(t + b3[None, :, None, None], 0.0)
    cls = jax.lax.conv_general_dilated(t, wc, (1, 1), "SAME",
                                       dimension_numbers=dn)
    cls = cls + bc[None, :, None, None]
    bbox = jax.lax.conv_general_dilated(t, wb, (1, 1), "SAME",
                                        dimension_numbers=dn)
    bbox = bbox + bb[None, :, None, None]

    logits = cls[0].reshape(A, HW)                     # (a, p)
    deltas = bbox[0].reshape(A, 4, HW)                 # (a, c, p)
    dx, dy = deltas[:, 0, :], deltas[:, 1, :]
    dw = jnp.minimum(deltas[:, 2, :], BBOX_XFORM_CLIP)
    dh = jnp.minimum(deltas[:, 3, :], BBOX_XFORM_CLIP)
    x1, y1, x2, y2 = anchors_cap[0], anchors_cap[1], anchors_cap[2], anchors_cap[3]
    w = x2 - x1
    h = y2 - y1
    cx = x1 + 0.5 * w
    cy = y1 + 0.5 * h
    pcx = dx * w + cx
    pcy = dy * h + cy
    pw = jnp.exp(dw) * w
    ph = jnp.exp(dh) * h
    probs = jax.nn.sigmoid(logits).reshape(-1)
    boxes = jnp.stack([pcx - 0.5 * pw, pcy - 0.5 * ph,
                       pcx + 0.5 * pw, pcy + 0.5 * ph], axis=-1).reshape(-1, 4)
    return probs, boxes


if __name__ == "__main__":
    key = jax.random.PRNGKey(0)
    ks = jax.random.split(key, 8)
    feature = jax.random.normal(ks[0], (N, C, H, W), jnp.float32)
    # deterministic synthetic weights (shapes follow RPNHead: 3x3 conv, 1x1 heads)
    w3 = jax.random.normal(ks[1], (C, C, 3, 3), jnp.float32) * 0.02
    b3 = jax.random.normal(ks[2], (C,), jnp.float32) * 0.01
    wc = jax.random.normal(ks[3], (A, C, 1, 1), jnp.float32) * 0.02
    bc = jax.random.normal(ks[4], (A,), jnp.float32) * 0.01
    wb = jax.random.normal(ks[5], (4 * A, C, 1, 1), jnp.float32) * 0.02
    bb = jax.random.normal(ks[6], (4 * A,), jnp.float32) * 0.01
    params = (w3, b3, wc, bc, wb, bb)

    # hoisted (done once, not per call): weight repacking + anchor packing
    packed = pack_params(*params)
    anchors_cap = grid_anchors_packed(level=0)

    scores, levels, boxes = rpn_parallel(feature, packed, anchors_cap, level=0)
    jax.block_until_ready((scores, levels, boxes))

    # correctness check: fused Pallas kernel (bf16 MXU / f32 accum) vs f32 XLA
    probs_k, boxes_k = fused_rpn_forward(feature, *packed, anchors_cap)
    probs_r, boxes_r = reference_fused(feature, params, anchors_cap)
    np.testing.assert_allclose(np.asarray(probs_k), np.asarray(probs_r),
                               rtol=1e-2, atol=1e-2)
    np.testing.assert_allclose(np.asarray(boxes_k), np.asarray(boxes_r),
                               rtol=2e-2, atol=0.5)

    print("KERNEL_OK")
</pallas_src>

<mosaic_0001>
module attributes {stable_mosaic.version = 11 : i64} {
  func.func @fused_rpn_kernel(%arg0: i32, %arg1: memref<1152x128xbf16, #tpu.memory_space<vmem>>, %arg2: memref<128x1152xbf16, #tpu.memory_space<vmem>>, %arg3: memref<128x1xf32, #tpu.memory_space<vmem>>, %arg4: memref<16x128xbf16, #tpu.memory_space<vmem>>, %arg5: memref<16x1xf32, #tpu.memory_space<vmem>>, %arg6: memref<4x3x128xf32, #tpu.memory_space<vmem>>, %arg7: memref<16x128xf32, #tpu.memory_space<vmem>>) attributes {dimension_semantics = [#tpu.dimension_semantics<parallel>], iteration_bounds = array<i64: 2>, scalar_prefetch = 0 : i64, scratch_operands = 0 : i64, tpu.core_type = #tpu.core_type<tc>, window_params = [{transform_indices = @transform_0, window_bounds = array<i64: 1152, 128>}, {pipeline_mode = #tpu.pipeline_mode<synchronous>, transform_indices = @transform_1, window_bounds = array<i64: 128, 1152>}, {pipeline_mode = #tpu.pipeline_mode<synchronous>, transform_indices = @transform_2, window_bounds = array<i64: 128, 1>}, {pipeline_mode = #tpu.pipeline_mode<synchronous>, transform_indices = @transform_3, window_bounds = array<i64: 16, 128>}, {pipeline_mode = #tpu.pipeline_mode<synchronous>, transform_indices = @transform_4, window_bounds = array<i64: 16, 1>}, {transform_indices = @transform_5, window_bounds = array<i64: 4, 3, 128>}, {transform_indices = @transform_6, window_bounds = array<i64: 16, 128>}]} {
    %c0 = arith.constant 0 : index
    %c0_0 = arith.constant 0 : index
    %0 = vector.load %arg2[%c0, %c0_0] : memref<128x1152xbf16, #tpu.memory_space<vmem>>, vector<128x1152xbf16>
    %c0_1 = arith.constant 0 : index
    %c0_2 = arith.constant 0 : index
    %1 = vector.load %arg1[%c0_1, %c0_2] : memref<1152x128xbf16, #tpu.memory_space<vmem>>, vector<1152x128xbf16>
    %cst = arith.constant dense<0.000000e+00> : vector<128x128xf32>
    %2 = tpu.matmul %0, %1, %cst {dimension_numbers = #tpu.dot_dimension_numbers<[1], [0], [0], [1], [0, 0, 1, 1], [], []>} : vector<128x1152xbf16>, vector<1152x128xbf16>, vector<128x128xf32> -> vector<128x128xf32>
    %c0_3 = arith.constant 0 : index
    %c0_4 = arith.constant 0 : index
    %3 = vector.load %arg3[%c0_3, %c0_4] : memref<128x1xf32, #tpu.memory_space<vmem>>, vector<128x1xf32>
    %4 = vector.broadcast %3 : vector<128x1xf32> to vector<128x128xf32>
    %5 = arith.addf %2, %4 : vector<128x128xf32>
    %cst_5 = arith.constant 0.000000e+00 : f32
    %6 = vector.broadcast %cst_5 : f32 to vector<128x128xf32>
    %7 = arith.maximumf %5, %6 : vector<128x128xf32>
    %c0_6 = arith.constant 0 : index
    %c0_7 = arith.constant 0 : index
    %8 = vector.load %arg4[%c0_6, %c0_7] : memref<16x128xbf16, #tpu.memory_space<vmem>>, vector<16x128xbf16>
    %9 = arith.truncf %7 : vector<128x128xf32> to vector<128x128xbf16>
    %cst_8 = arith.constant dense<0.000000e+00> : vector<16x128xf32>
    %10 = tpu.matmul %8, %9, %cst_8 {dimension_numbers = #tpu.dot_dimension_numbers<[1], [0], [0], [1], [0, 0, 1, 1], [], []>} : vector<16x128xbf16>, vector<128x128xbf16>, vector<16x128xf32> -> vector<16x128xf32>
    %c0_9 = arith.constant 0 : index
    %c0_10 = arith.constant 0 : index
    %11 = vector.load %arg5[%c0_9, %c0_10] : memref<16x1xf32, #tpu.memory_space<vmem>>, vector<16x1xf32>
    %12 = vector.broadcast %11 : vector<16x1xf32> to vector<16x128xf32>
    %13 = arith.addf %10, %12 : vector<16x128xf32>
    %14 = vector.extract_strided_slice %13 {offsets = [0, 0], sizes = [3, 128], strides = [1, 1]} : vector<16x128xf32> to vector<3x128xf32>
    %15 = vector.extract_strided_slice %13 {offsets = [3, 0], sizes = [3, 128], strides = [1, 1]} : vector<16x128xf32> to vector<3x128xf32>
    %16 = vector.extract_strided_slice %13 {offsets = [6, 0], sizes = [3, 128], strides = [1, 1]} : vector<16x128xf32> to vector<3x128xf32>
    %17 = vector.extract_strided_slice %13 {offsets = [9, 0], sizes = [3, 128], strides = [1, 1]} : vector<16x128xf32> to vector<3x128xf32>
    %cst_11 = arith.constant 4.13516665 : f32
    %18 = vector.broadcast %cst_11 : f32 to vector<3x128xf32>
    %19 = arith.minimumf %17, %18 : vector<3x128xf32>
    %20 = vector.extract_strided_slice %13 {offsets = [12, 0], sizes = [3, 128], strides = [1, 1]} : vector<16x128xf32> to vector<3x128xf32>
    %cst_12 = arith.constant 4.13516665 : f32
    %21 = vector.broadcast %cst_12 : f32 to vector<3x128xf32>
    %22 = arith.minimumf %20, %21 : vector<3x128xf32>
    %c0_13 = arith.constant 0 : index
    %c0_14 = arith.constant 0 : index
    %c0_15 = arith.constant 0 : index
    %23 = vector.load %arg6[%c0_13, %c0_14, %c0_15] : memref<4x3x128xf32, #tpu.memory_space<vmem>>, vector<4x3x128xf32>
    %24 = vector.extract_strided_slice %23 {offsets = [0, 0, 0], sizes = [1, 3, 128], strides = [1, 1, 1]} : vector<4x3x128xf32> to vector<1x3x128xf32>
    %25 = vector.shape_cast %24 : vector<1x3x128xf32> to vector<3x128xf32>
    %26 = vector.extract_strided_slice %23 {offsets = [1, 0, 0], sizes = [1, 3, 128], strides = [1, 1, 1]} : vector<4x3x128xf32> to vector<1x3x128xf32>
    %27 = vector.shape_cast %26 : vector<1x3x128xf32> to vector<3x128xf32>
    %28 = vector.extract_strided_slice %23 {offsets = [2, 0, 0], sizes = [1, 3, 128], strides = [1, 1, 1]} : vector<4x3x128xf32> to vector<1x3x128xf32>
    %29 = vector.shape_cast %28 : vector<1x3x128xf32> to vector<3x128xf32>
    %30 = vector.extract_strided_slice %23 {offsets = [3, 0, 0], sizes = [1, 3, 128], strides = [1, 1, 1]} : vector<4x3x128xf32> to vector<1x3x128xf32>
    %31 = vector.shape_cast %30 : vector<1x3x128xf32> to vector<3x128xf32>
    %32 = arith.subf %29, %25 : vector<3x128xf32>
    %33 = arith.subf %31, %27 : vector<3x128xf32>
    %cst_16 = arith.constant 5.000000e-01 : f32
    %34 = vector.broadcast %cst_16 : f32 to vector<3x128xf32>
    %35 = arith.mulf %34, %32 : vector<3x128xf32>
    %36 = arith.addf %25, %35 : vector<3x128xf32>
    %cst_17 = arith.constant 5.000000e-01 : f32
    %37 = vector.broadcast %cst_17 : f32 to vector<3x128xf32>
    %38 = arith.mulf %37, %33 : vector<3x128xf32>
    %39 = arith.addf %27, %38 : vector<3x128xf32>
    %40 = arith.mulf %15, %32 : vector<3x128xf32>
    %41 = arith.addf %40, %36 : vector<3x128xf32>
    %42 = arith.mulf %16, %33 : vector<3x128xf32>
    %43 = arith.addf %42, %39 : vector<3x128xf32>
    %44 = math.exp %19 : vector<3x128xf32>
    %45 = arith.mulf %44, %32 : vector<3x128xf32>
    %46 = math.exp %22 : vector<3x128xf32>
    %47 = arith.mulf %46, %33 : vector<3x128xf32>
    %48 = arith.negf %14 : vector<3x128xf32>
    %49 = math.exp %48 : vector<3x128xf32>
    %cst_18 = arith.constant 1.000000e+00 : f32
    %50 = vector.broadcast %cst_18 : f32 to vector<3x128xf32>
    %51 = arith.addf %50, %49 : vector<3x128xf32>
    %52 = arith.divf %50, %51 : vector<3x128xf32>
    %cst_19 = arith.constant 0.000000e+00 : f32
    %53 = vector.broadcast %cst_19 : f32 to vector<1x128xf32>
    %cst_20 = arith.constant 5.000000e-01 : f32
    %54 = vector.broadcast %cst_20 : f32 to vector<3x128xf32>
    %55 = arith.mulf %54, %45 : vector<3x128xf32>
    %56 = arith.subf %41, %55 : vector<3x128xf32>
    %cst_21 = arith.constant 5.000000e-01 : f32
    %57 = vector.broadcast %cst_21 : f32 to vector<3x128xf32>
    %58 = arith.mulf %57, %47 : vector<3x128xf32>
    %59 = arith.subf %43, %58 : vector<3x128xf32>
    %cst_22 = arith.constant 5.000000e-01 : f32
    %60 = vector.broadcast %cst_22 : f32 to vector<3x128xf32>
    %61 = arith.mulf %60, %45 : vector<3x128xf32>
    %62 = arith.addf %41, %61 : vector<3x128xf32>
    %cst_23 = arith.constant 5.000000e-01 : f32
    %63 = vector.broadcast %cst_23 : f32 to vector<3x128xf32>
    %64 = arith.mulf %63, %47 : vector<3x128xf32>
    %65 = arith.addf %43, %64 : vector<3x128xf32>
    %66 = tpu.concatenate %52, %56, %59, %62, %65, %53 in 0 : vector<3x128xf32>, vector<3x128xf32>, vector<3x128xf32>, vector<3x128xf32>, vector<3x128xf32>, vector<1x128xf32> -> vector<16x128xf32>
    %c0_24 = arith.constant 0 : index
    %c0_25 = arith.constant 0 : index
    %67 = vector.load %arg7[%c0_24, %c0_25] : memref<16x128xf32, #tpu.memory_space<vmem>>, vector<16x128xf32>
    tpu.vector_store %arg7[%c0_24, %c0_25], %66 {strides = array<i32>} : memref<16x128xf32, #tpu.memory_space<vmem>>, vector<16x128xf32>,
    return
  }
  func.func @transform_0(%arg0: i32) -> (i32, i32) {
    %c0_i32 = arith.constant 0 : i32
    %c0_i32_0 = arith.constant 0 : i32
    return %c0_i32, %arg0 : i32, i32
  }
  func.func @transform_1(%arg0: i32) -> (i32, i32) {
    %c0_i32 = arith.constant 0 : i32
    %c0_i32_0 = arith.constant 0 : i32
    %c0_i32_1 = arith.constant 0 : i32
    return %c0_i32, %c0_i32_0 : i32, i32
  }
  func.func @transform_2(%arg0: i32) -> (i32, i32) {
    %c0_i32 = arith.constant 0 : i32
    %c0_i32_0 = arith.constant 0 : i32
    %c0_i32_1 = arith.constant 0 : i32
    return %c0_i32, %c0_i32_0 : i32, i32
  }
  func.func @transform_3(%arg0: i32) -> (i32, i32) {
    %c0_i32 = arith.constant 0 : i32
    %c0_i32_0 = arith.constant 0 : i32
    %c0_i32_1 = arith.constant 0 : i32
    return %c0_i32, %c0_i32_0 : i32, i32
  }
  func.func @transform_4(%arg0: i32) -> (i32, i32) {
    %c0_i32 = arith.constant 0 : i32
    %c0_i32_0 = arith.constant 0 : i32
    %c0_i32_1 = arith.constant 0 : i32
    return %c0_i32, %c0_i32_0 : i32, i32
  }
  func.func @transform_5(%arg0: i32) -> (i32, i32, i32) {
    %c0_i32 = arith.constant 0 : i32
    %c0_i32_0 = arith.constant 0 : i32
    %c0_i32_1 = arith.constant 0 : i32
    return %c0_i32, %c0_i32_0, %arg0 : i32, i32, i32
  }
  func.func @transform_6(%arg0: i32) -> (i32, i32) {
    %c0_i32 = arith.constant 0 : i32
    %c0_i32_0 = arith.constant 0 : i32
    return %c0_i32, %arg0 : i32, i32
  }
}

</mosaic_0001>

<bundles_post_ra>
// kernel: fused_rpn_forward.1
= control target key start
LH: loop header
LB: loop body
LE: loop exit
PB: predicated region body
PF: predicated region fallthrough
CT: control target
= control target key end

     0   :  { %s3589_s21 = smov 0   ;;  %s3591_s22 = smov 0   ;;  %s4408_s0 = inlined_call_operand.vmem [shape: bf16[1152,256], index: 0, kind: input, shape index: {}]   ;;  %s4409_s1 = inlined_call_operand.vmem [shape: bf16[128,1152], index: 1, kind: input, shape index: {}]   ;;  %s4410_s2 = inlined_call_operand.vmem [shape: f32[128,1], index: 2, kind: input, shape index: {}]   ;;  %s4411_s3 = inlined_call_operand.vmem [shape: bf16[16,128], index: 3, kind: input, shape index: {}]   ;;  %s4412_s4 = inlined_call_operand.vmem [shape: f32[16,1], index: 4, kind: input, shape index: {}]   ;;  %s4413_s5 = inlined_call_operand.vmem [shape: f32[4,3,256], index: 5, kind: input, shape index: {}]   ;;  %s4414_s6 = inlined_call_operand.vmem [shape: f32[16,256], index: 6, kind: output, shape index: {}]  }
   0x1   :  { %s3593_s23 = smov 0  }
   0x2 LB: > { %s2820_s24 = sadd.s32 4294967295, %s3549_s23   ;;  %s3606_s25 = sadd.s32 1, %s3549_s23   ;;  %s3549_s23 = sphi %s3593_s23, %s4419_s23   ;;  %s3545_s22 = sphi %s3591_s22, %s4418_s22   ;;  %s3541_s21 = sphi %s3589_s21, %s4417_s21  }
   0x3   : > { %s20_s26 = ssub.s32 %s3549_s23, %s3606_s25  ;;  %s23_s27 = sadd.s32 1, %s3545_s22 }
   0x4   : > { %p21_p0 = scmp.eq.s32.totalorder %s20_s26, 0  ;;  %p30_p1 = scmp.ne.s32.totalorder %s3545_s22, %s3541_s21 }
   0x5   : > { %p31_p2 = scmp.eq.s32.totalorder %s3549_s23, 0  ;;  %p170_p3 = scmp.eq.s32.totalorder %s2820_s24, 1 }
   0x6   : > { %s3617_s28 = scalar_select %p21_p0, %s3545_s22, %s23_s27  }
   0x7   : > { %p3619_p4 = por %p31_p2, %p30_p1  ;;  %p3623_p5 = por %p170_p3, %p30_p1 }
   0x8   : > { %p2823_p6 = scmp.ge.s32.totalorder %s3549_s23, 2 }
   0xa   : > { %204 = sbr.rel (%p2823_p6) target bundleno = 124 (0x7c), region = 32 }
  0x11   : > { %207 = sbr.rel (!%p3619_p4) target bundleno = 117 (0x75), region = 36  ;;  %s209_s7 = sand.u32 (%p3619_p4), 1, %s3545_s22  }
  0x12   : > { %s2824_s8 = sshll.u32 (%p3619_p4), %s3549_s23, 2  ;;  %s3313_s9 = smul.u32 (%p3619_p4), 576, %s209_s7 }
  0x13   : > { %s3635_s12 = scalar_lea.vmem (%p3619_p4), %s4408_s0, %s2824_s8 }
  0x14   : > { %v229_v0 = vld [vmem:[%s3635_s12] sm:$0xf] (%p3619_p4)  ;;  %v231_v1 = vld [vmem:[%s3635_s12 + $0x8] sm:$0xf] (%p3619_p4)  ;;  %v233_v2 = vld [vmem:[%s3635_s12 + $0x10] sm:$0xf] (%p3619_p4) }
  0x15   : > { %v235_v3 = vld [vmem:[%s3635_s12 + $0x18] sm:$0xf] (%p3619_p4)  ;;  %v237_v4 = vld [vmem:[%s3635_s12 + $0x20] sm:$0xf] (%p3619_p4)  ;;  %s3642_s13 = scalar_lea.vmem (%p3619_p4), [#allocation2], %s3313_s9 }
  0x16   : > { %230 = vst [vmem:[%s3642_s13] sm:$0xf] (%p3619_p4), %v229_v0  ;;  %232 = vst [vmem:[%s3642_s13 + $0x4] sm:$0xf] (%p3619_p4), %v231_v1  ;;  %v239_v5 = vld [vmem:[%s3635_s12 + $0x28] sm:$0xf] (%p3619_p4) }
  0x17   : > { %234 = vst [vmem:[%s3642_s13 + $0x8] sm:$0xf] (%p3619_p4), %v233_v2  ;;  %236 = vst [vmem:[%s3642_s13 + $0xc] sm:$0xf] (%p3619_p4), %v235_v3  ;;  %v241_v6 = vld [vmem:[%s3635_s12 + $0x30] sm:$0xf] (%p3619_p4) }
  0x18   : > { %238 = vst [vmem:[%s3642_s13 + $0x10] sm:$0xf] %v237_v4  ;;  %v243_v7 = vld [vmem:[%s3635_s12 + $0x38] sm:$0xf]  ;;  %240 = vst [vmem:[%s3642_s13 + $0x14] sm:$0xf] %v239_v5 }
  0x19   : > { %242 = vst [vmem:[%s3642_s13 + $0x18] sm:$0xf] %v241_v6  ;;  %244 = vst [vmem:[%s3642_s13 + $0x1c] sm:$0xf] %v243_v7  ;;  %v245_v8 = vld [vmem:[%s3635_s12 + $0x40] sm:$0xf] }
  0x1a   : > { %v247_v9 = vld [vmem:[%s3635_s12 + $0x48] sm:$0xf]  ;;  %v249_v10 = vld [vmem:[%s3635_s12 + $0x50] sm:$0xf]  ;;  %246 = vst [vmem:[%s3642_s13 + $0x20] sm:$0xf] %v245_v8 }
  0x1b   : > { %248 = vst [vmem:[%s3642_s13 + $0x24] sm:$0xf] %v247_v9  ;;  %250 = vst [vmem:[%s3642_s13 + $0x28] sm:$0xf] %v249_v10  ;;  %v251_v11 = vld [vmem:[%s3635_s12 + $0x58] sm:$0xf] }
  0x1c   : > { %v253_v12 = vld [vmem:[%s3635_s12 + $0x60] sm:$0xf]  ;;  %v255_v13 = vld [vmem:[%s3635_s12 + $0x68] sm:$0xf]  ;;  %252 = vst [vmem:[%s3642_s13 + $0x2c] sm:$0xf] %v251_v11 }
  0x1d   : > { %254 = vst [vmem:[%s3642_s13 + $0x30] sm:$0xf] %v253_v12  ;;  %256 = vst [vmem:[%s3642_s13 + $0x34] sm:$0xf] %v255_v13  ;;  %v257_v14 = vld [vmem:[%s3635_s12 + $0x70] sm:$0xf] }
  0x1e   : > { %v259_v15 = vld [vmem:[%s3635_s12 + $0x78] sm:$0xf]  ;;  %v261_v16 = vld [vmem:[%s3635_s12 + $0x80] sm:$0xf]  ;;  %258 = vst [vmem:[%s3642_s13 + $0x38] sm:$0xf] %v257_v14 }
  0x1f   : > { %260 = vst [vmem:[%s3642_s13 + $0x3c] sm:$0xf] %v259_v15  ;;  %262 = vst [vmem:[%s3642_s13 + $0x40] sm:$0xf] %v261_v16  ;;  %v263_v17 = vld [vmem:[%s3635_s12 + $0x88] sm:$0xf] }
  0x20   : > { %v265_v18 = vld [vmem:[%s3635_s12 + $0x90] sm:$0xf]  ;;  %v267_v19 = vld [vmem:[%s3635_s12 + $0x98] sm:$0xf]  ;;  %264 = vst [vmem:[%s3642_s13 + $0x44] sm:$0xf] %v263_v17 }
  0x21   : > { %266 = vst [vmem:[%s3642_s13 + $0x48] sm:$0xf] %v265_v18  ;;  %268 = vst [vmem:[%s3642_s13 + $0x4c] sm:$0xf] %v267_v19  ;;  %v269_v20 = vld [vmem:[%s3635_s12 + $0xa0] sm:$0xf] }
  0x22   : > { %v271_v21 = vld [vmem:[%s3635_s12 + $0xa8] sm:$0xf]  ;;  %v273_v22 = vld [vmem:[%s3635_s12 + $0xb0] sm:$0xf]  ;;  %270 = vst [vmem:[%s3642_s13 + $0x50] sm:$0xf] %v269_v20 }
  0x23   : > { %272 = vst [vmem:[%s3642_s13 + $0x54] sm:$0xf] %v271_v21  ;;  %274 = vst [vmem:[%s3642_s13 + $0x58] sm:$0xf] %v273_v22  ;;  %v275_v23 = vld [vmem:[%s3635_s12 + $0xb8] sm:$0xf] }
  0x24   : > { %v277_v24 = vld [vmem:[%s3635_s12 + $0xc0] sm:$0xf]  ;;  %v279_v25 = vld [vmem:[%s3635_s12 + $0xc8] sm:$0xf]  ;;  %276 = vst [vmem:[%s3642_s13 + $0x5c] sm:$0xf] %v275_v23 }
  0x25   : > { %278 = vst [vmem:[%s3642_s13 + $0x60] sm:$0xf] %v277_v24  ;;  %280 = vst [vmem:[%s3642_s13 + $0x64] sm:$0xf] %v279_v25  ;;  %v281_v26 = vld [vmem:[%s3635_s12 + $0xd0] sm:$0xf] }
  0x26   : > { %v283_v27 = vld [vmem:[%s3635_s12 + $0xd8] sm:$0xf]  ;;  %v285_v28 = vld [vmem:[%s3635_s12 + $0xe0] sm:$0xf]  ;;  %282 = vst [vmem:[%s3642_s13 + $0x68] sm:$0xf] %v281_v26 }
  0x27   : > { %284 = vst [vmem:[%s3642_s13 + $0x6c] sm:$0xf] %v283_v27  ;;  %286 = vst [vmem:[%s3642_s13 + $0x70] sm:$0xf] %v285_v28  ;;  %v287_v29 = vld [vmem:[%s3635_s12 + $0xe8] sm:$0xf] }
  0x28   : > { %v289_v30 = vld [vmem:[%s3635_s12 + $0xf0] sm:$0xf]  ;;  %v291_v31 = vld [vmem:[%s3635_s12 + $0xf8] sm:$0xf]  ;;  %288 = vst [vmem:[%s3642_s13 + $0x74] sm:$0xf] %v287_v29 }
  0x29   : > { %290 = vst [vmem:[%s3642_s13 + $0x78] sm:$0xf] %v289_v30  ;;  %292 = vst [vmem:[%s3642_s13 + $0x7c] sm:$0xf] %v291_v31  ;;  %v293_v32 = vld [vmem:[%s3635_s12 + $0x100] sm:$0xf] }
  0x2a   : > { %v295_v33 = vld [vmem:[%s3635_s12 + $0x108] sm:$0xf]  ;;  %v297_v34 = vld [vmem:[%s3635_s12 + $0x110] sm:$0xf]  ;;  %294 = vst [vmem:[%s3642_s13 + $0x80] sm:$0xf] %v293_v32 }
  0x2b   : > { %296 = vst [vmem:[%s3642_s13 + $0x84] sm:$0xf] %v295_v33  ;;  %298 = vst [vmem:[%s3642_s13 + $0x88] sm:$0xf] %v297_v34  ;;  %v299_v35 = vld [vmem:[%s3635_s12 + $0x118] sm:$0xf] }
  0x2c   : > { %v301_v36 = vld [vmem:[%s3635_s12 + $0x120] sm:$0xf]  ;;  %v303_v37 = vld [vmem:[%s3635_s12 + $0x128] sm:$0xf]  ;;  %300 = vst [vmem:[%s3642_s13 + $0x8c] sm:$0xf] %v299_v35 }
  0x2d   : > { %302 = vst [vmem:[%s3642_s13 + $0x90] sm:$0xf] %v301_v36  ;;  %304 = vst [vmem:[%s3642_s13 + $0x94] sm:$0xf] %v303_v37  ;;  %v305_v38 = vld [vmem:[%s3635_s12 + $0x130] sm:$0xf] }
  0x2e   : > { %v307_v39 = vld [vmem:[%s3635_s12 + $0x138] sm:$0xf]  ;;  %v309_v40 = vld [vmem:[%s3635_s12 + $0x140] sm:$0xf]  ;;  %306 = vst [vmem:[%s3642_s13 + $0x98] sm:$0xf] %v305_v38 }
  0x2f   : > { %308 = vst [vmem:[%s3642_s13 + $0x9c] sm:$0xf] %v307_v39  ;;  %310 = vst [vmem:[%s3642_s13 + $0xa0] sm:$0xf] %v309_v40  ;;  %v311_v41 = vld [vmem:[%s3635_s12 + $0x148] sm:$0xf] }
  0x30   : > { %v313_v42 = vld [vmem:[%s3635_s12 + $0x150] sm:$0xf]  ;;  %v315_v43 = vld [vmem:[%s3635_s12 + $0x158] sm:$0xf]  ;;  %312 = vst [vmem:[%s3642_s13 + $0xa4] sm:$0xf] %v311_v41 }
  0x31   : > { %314 = vst [vmem:[%s3642_s13 + $0xa8] sm:$0xf] %v313_v42  ;;  %316 = vst [vmem:[%s3642_s13 + $0xac] sm:$0xf] %v315_v43  ;;  %v317_v44 = vld [vmem:[%s3635_s12 + $0x160] sm:$0xf] }
  0x32   : > { %v319_v45 = vld [vmem:[%s3635_s12 + $0x168] sm:$0xf]  ;;  %v321_v46 = vld [vmem:[%s3635_s12 + $0x170] sm:$0xf]  ;;  %318 = vst [vmem:[%s3642_s13 + $0xb0] sm:$0xf] %v317_v44 }
  0x33   : > { %320 = vst [vmem:[%s3642_s13 + $0xb4] sm:$0xf] %v319_v45  ;;  %322 = vst [vmem:[%s3642_s13 + $0xb8] sm:$0xf] %v321_v46  ;;  %v323_v47 = vld [vmem:[%s3635_s12 + $0x178] sm:$0xf] }
  0x34   : > { %v325_v48 = vld [vmem:[%s3635_s12 + $0x180] sm:$0xf]  ;;  %v327_v49 = vld [vmem:[%s3635_s12 + $0x188] sm:$0xf]  ;;  %324 = vst [vmem:[%s3642_s13 + $0xbc] sm:$0xf] %v323_v47 }
  0x35   : > { %326 = vst [vmem:[%s3642_s13 + $0xc0] sm:$0xf] %v325_v48  ;;  %328 = vst [vmem:[%s3642_s13 + $0xc4] sm:$0xf] %v327_v49  ;;  %v329_v50 = vld [vmem:[%s3635_s12 + $0x190] sm:$0xf] }
  0x36   : > { %v331_v51 = vld [vmem:[%s3635_s12 + $0x198] sm:$0xf]  ;;  %v333_v52 = vld [vmem:[%s3635_s12 + $0x1a0] sm:$0xf]  ;;  %330 = vst [vmem:[%s3642_s13 + $0xc8] sm:$0xf] %v329_v50 }
  0x37   : > { %332 = vst [vmem:[%s3642_s13 + $0xcc] sm:$0xf] %v331_v51  ;;  %334 = vst [vmem:[%s3642_s13 + $0xd0] sm:$0xf] %v333_v52  ;;  %v335_v53 = vld [vmem:[%s3635_s12 + $0x1a8] sm:$0xf] }
  0x38   : > { %v337_v54 = vld [vmem:[%s3635_s12 + $0x1b0] sm:$0xf]  ;;  %v339_v55 = vld [vmem:[%s3635_s12 + $0x1b8] sm:$0xf]  ;;  %336 = vst [vmem:[%s3642_s13 + $0xd4] sm:$0xf] %v335_v53 }
  0x39   : > { %338 = vst [vmem:[%s3642_s13 + $0xd8] sm:$0xf] %v337_v54  ;;  %340 = vst [vmem:[%s3642_s13 + $0xdc] sm:$0xf] %v339_v55  ;;  %v341_v56 = vld [vmem:[%s3635_s12 + $0x1c0] sm:$0xf] }
  0x3a   : > { %v343_v57 = vld [vmem:[%s3635_s12 + $0x1c8] sm:$0xf]  ;;  %v345_v58 = vld [vmem:[%s3635_s12 + $0x1d0] sm:$0xf]  ;;  %342 = vst [vmem:[%s3642_s13 + $0xe0] sm:$0xf] %v341_v56 }
  0x3b   : > { %344 = vst [vmem:[%s3642_s13 + $0xe4] sm:$0xf] %v343_v57  ;;  %346 = vst [vmem:[%s3642_s13 + $0xe8] sm:$0xf] %v345_v58  ;;  %v347_v59 = vld [vmem:[%s3635_s12 + $0x1d8] sm:$0xf] }
  0x3c   : > { %v349_v60 = vld [vmem:[%s3635_s12 + $0x1e0] sm:$0xf]  ;;  %v351_v61 = vld [vmem:[%s3635_s12 + $0x1e8] sm:$0xf]  ;;  %348 = vst [vmem:[%s3642_s13 + $0xec] sm:$0xf] %v347_v59 }
  0x3d   : > { %350 = vst [vmem:[%s3642_s13 + $0xf0] sm:$0xf] %v349_v60  ;;  %352 = vst [vmem:[%s3642_s13 + $0xf4] sm:$0xf] %v351_v61  ;;  %v353_v62 = vld [vmem:[%s3635_s12 + $0x1f0] sm:$0xf] }
  0x3e   : > { %v355_v63 = vld [vmem:[%s3635_s12 + $0x1f8] sm:$0xf]  ;;  %v357_v0 = vld [vmem:[%s3635_s12 + $0x200] sm:$0xf]  ;;  %354 = vst [vmem:[%s3642_s13 + $0xf8] sm:$0xf] %v353_v62 }
  0x3f   : > { %356 = vst [vmem:[%s3642_s13 + $0xfc] sm:$0xf] %v355_v63  ;;  %358 = vst [vmem:[%s3642_s13 + $0x100] sm:$0xf] %v357_v0  ;;  %v359_v1 = vld [vmem:[%s3635_s12 + $0x208] sm:$0xf] }
  0x40   : > { %v361_v2 = vld [vmem:[%s3635_s12 + $0x210] sm:$0xf]  ;;  %v363_v3 = vld [vmem:[%s3635_s12 + $0x218] sm:$0xf]  ;;  %360 = vst [vmem:[%s3642_s13 + $0x104] sm:$0xf] %v359_v1 }
  0x41   : > { %362 = vst [vmem:[%s3642_s13 + $0x108] sm:$0xf] %v361_v2  ;;  %364 = vst [vmem:[%s3642_s13 + $0x10c] sm:$0xf] %v363_v3  ;;  %v365_v4 = vld [vmem:[%s3635_s12 + $0x220] sm:$0xf] }
  0x42   : > { %v367_v5 = vld [vmem:[%s3635_s12 + $0x228] sm:$0xf]  ;;  %v369_v6 = vld [vmem:[%s3635_s12 + $0x230] sm:$0xf]  ;;  %366 = vst [vmem:[%s3642_s13 + $0x110] sm:$0xf] %v365_v4 }
  0x43   : > { %368 = vst [vmem:[%s3642_s13 + $0x114] sm:$0xf] %v367_v5  ;;  %370 = vst [vmem:[%s3642_s13 + $0x118] sm:$0xf] %v369_v6  ;;  %v371_v7 = vld [vmem:[%s3635_s12 + $0x238] sm:$0xf] }
  0x44   : > { %v373_v8 = vld [vmem:[%s3635_s12 + $0x240] sm:$0xf]  ;;  %v375_v9 = vld [vmem:[%s3635_s12 + $0x248] sm:$0xf]  ;;  %372 = vst [vmem:[%s3642_s13 + $0x11c] sm:$0xf] %v371_v7 }
  0x45   : > { %374 = vst [vmem:[%s3642_s13 + $0x120] sm:$0xf] %v373_v8  ;;  %376 = vst [vmem:[%s3642_s13 + $0x124] sm:$0xf] %v375_v9  ;;  %v377_v10 = vld [vmem:[%s3635_s12 + $0x250] sm:$0xf] }
  0x46   : > { %v379_v11 = vld [vmem:[%s3635_s12 + $0x258] sm:$0xf]  ;;  %v381_v12 = vld [vmem:[%s3635_s12 + $0x260] sm:$0xf]  ;;  %378 = vst [vmem:[%s3642_s13 + $0x128] sm:$0xf] %v377_v10 }
  0x47   : > { %380 = vst [vmem:[%s3642_s13 + $0x12c] sm:$0xf] %v379_v11  ;;  %382 = vst [vmem:[%s3642_s13 + $0x130] sm:$0xf] %v381_v12  ;;  %v383_v13 = vld [vmem:[%s3635_s12 + $0x268] sm:$0xf] }
  0x48   : > { %v385_v14 = vld [vmem:[%s3635_s12 + $0x270] sm:$0xf]  ;;  %v387_v15 = vld [vmem:[%s3635_s12 + $0x278] sm:$0xf]  ;;  %384 = vst [vmem:[%s3642_s13 + $0x134] sm:$0xf] %v383_v13 }
  0x49   : > { %386 = vst [vmem:[%s3642_s13 + $0x138] sm:$0xf] %v385_v14  ;;  %388 = vst [vmem:[%s3642_s13 + $0x13c] sm:$0xf] %v387_v15  ;;  %v389_v16 = vld [vmem:[%s3635_s12 + $0x280] sm:$0xf] }
  0x4a   : > { %v391_v17 = vld [vmem:[%s3635_s12 + $0x288] sm:$0xf]  ;;  %v393_v18 = vld [vmem:[%s3635_s12 + $0x290] sm:$0xf]  ;;  %390 = vst [vmem:[%s3642_s13 + $0x140] sm:$0xf] %v389_v16 }
  0x4b   : > { %392 = vst [vmem:[%s3642_s13 + $0x144] sm:$0xf] %v391_v17  ;;  %394 = vst [vmem:[%s3642_s13 + $0x148] sm:$0xf] %v393_v18  ;;  %v395_v19 = vld [vmem:[%s3635_s12 + $0x298] sm:$0xf] }
  0x4c   : > { %v397_v20 = vld [vmem:[%s3635_s12 + $0x2a0] sm:$0xf]  ;;  %v399_v21 = vld [vmem:[%s3635_s12 + $0x2a8] sm:$0xf]  ;;  %396 = vst [vmem:[%s3642_s13 + $0x14c] sm:$0xf] %v395_v19 }
  0x4d   : > { %398 = vst [vmem:[%s3642_s13 + $0x150] sm:$0xf] %v397_v20  ;;  %400 = vst [vmem:[%s3642_s13 + $0x154] sm:$0xf] %v399_v21  ;;  %v401_v22 = vld [vmem:[%s3635_s12 + $0x2b0] sm:$0xf] }
  0x4e   : > { %v403_v23 = vld [vmem:[%s3635_s12 + $0x2b8] sm:$0xf]  ;;  %v405_v24 = vld [vmem:[%s3635_s12 + $0x2c0] sm:$0xf]  ;;  %402 = vst [vmem:[%s3642_s13 + $0x158] sm:$0xf] %v401_v22 }
  0x4f   : > { %404 = vst [vmem:[%s3642_s13 + $0x15c] sm:$0xf] %v403_v23  ;;  %406 = vst [vmem:[%s3642_s13 + $0x160] sm:$0xf] %v405_v24  ;;  %v407_v25 = vld [vmem:[%s3635_s12 + $0x2c8] sm:$0xf] }
  0x50   : > { %v409_v26 = vld [vmem:[%s3635_s12 + $0x2d0] sm:$0xf]  ;;  %v411_v27 = vld [vmem:[%s3635_s12 + $0x2d8] sm:$0xf]  ;;  %408 = vst [vmem:[%s3642_s13 + $0x164] sm:$0xf] %v407_v25 }
  0x51   : > { %410 = vst [vmem:[%s3642_s13 + $0x168] sm:$0xf] %v409_v26  ;;  %412 = vst [vmem:[%s3642_s13 + $0x16c] sm:$0xf] %v411_v27  ;;  %v413_v28 = vld [vmem:[%s3635_s12 + $0x2e0] sm:$0xf] }
  0x52   : > { %v415_v29 = vld [vmem:[%s3635_s12 + $0x2e8] sm:$0xf]  ;;  %v417_v30 = vld [vmem:[%s3635_s12 + $0x2f0] sm:$0xf]  ;;  %414 = vst [vmem:[%s3642_s13 + $0x170] sm:$0xf] %v413_v28 }
  0x53   : > { %416 = vst [vmem:[%s3642_s13 + $0x174] sm:$0xf] %v415_v29  ;;  %418 = vst [vmem:[%s3642_s13 + $0x178] sm:$0xf] %v417_v30  ;;  %v419_v31 = vld [vmem:[%s3635_s12 + $0x2f8] sm:$0xf] }
  0x54   : > { %v421_v32 = vld [vmem:[%s3635_s12 + $0x300] sm:$0xf]  ;;  %v423_v33 = vld [vmem:[%s3635_s12 + $0x308] sm:$0xf]  ;;  %420 = vst [vmem:[%s3642_s13 + $0x17c] sm:$0xf] %v419_v31 }
  0x55   : > { %422 = vst [vmem:[%s3642_s13 + $0x180] sm:$0xf] %v421_v32  ;;  %424 = vst [vmem:[%s3642_s13 + $0x184] sm:$0xf] %v423_v33  ;;  %v425_v34 = vld [vmem:[%s3635_s12 + $0x310] sm:$0xf] }
  0x56   : > { %v427_v35 = vld [vmem:[%s3635_s12 + $0x318] sm:$0xf]  ;;  %v429_v36 = vld [vmem:[%s3635_s12 + $0x320] sm:$0xf]  ;;  %426 = vst [vmem:[%s3642_s13 + $0x188] sm:$0xf] %v425_v34 }
  0x57   : > { %428 = vst [vmem:[%s3642_s13 + $0x18c] sm:$0xf] %v427_v35  ;;  %430 = vst [vmem:[%s3642_s13 + $0x190] sm:$0xf] %v429_v36  ;;  %v431_v37 = vld [vmem:[%s3635_s12 + $0x328] sm:$0xf] }
  0x58   : > { %v433_v38 = vld [vmem:[%s3635_s12 + $0x330] sm:$0xf]  ;;  %v435_v39 = vld [vmem:[%s3635_s12 + $0x338] sm:$0xf]  ;;  %432 = vst [vmem:[%s3642_s13 + $0x194] sm:$0xf] %v431_v37 }
  0x59   : > { %434 = vst [vmem:[%s3642_s13 + $0x198] sm:$0xf] %v433_v38  ;;  %436 = vst [vmem:[%s3642_s13 + $0x19c] sm:$0xf] %v435_v39  ;;  %v437_v40 = vld [vmem:[%s3635_s12 + $0x340] sm:$0xf] }
  0x5a   : > { %v439_v41 = vld [vmem:[%s3635_s12 + $0x348] sm:$0xf]  ;;  %v441_v42 = vld [vmem:[%s3635_s12 + $0x350] sm:$0xf]  ;;  %438 = vst [vmem:[%s3642_s13 + $0x1a0] sm:$0xf] %v437_v40 }
  0x5b   : > { %440 = vst [vmem:[%s3642_s13 + $0x1a4] sm:$0xf] %v439_v41  ;;  %442 = vst [vmem:[%s3642_s13 + $0x1a8] sm:$0xf] %v441_v42  ;;  %v443_v43 = vld [vmem:[%s3635_s12 + $0x358] sm:$0xf] }
  0x5c   : > { %v445_v44 = vld [vmem:[%s3635_s12 + $0x360] sm:$0xf]  ;;  %v447_v45 = vld [vmem:[%s3635_s12 + $0x368] sm:$0xf]  ;;  %444 = vst [vmem:[%s3642_s13 + $0x1ac] sm:$0xf] %v443_v43 }
  0x5d   : > { %446 = vst [vmem:[%s3642_s13 + $0x1b0] sm:$0xf] %v445_v44  ;;  %448 = vst [vmem:[%s3642_s13 + $0x1b4] sm:$0xf] %v447_v45  ;;  %v449_v46 = vld [vmem:[%s3635_s12 + $0x370] sm:$0xf] }
  0x5e   : > { %v451_v47 = vld [vmem:[%s3635_s12 + $0x378] sm:$0xf]  ;;  %v453_v48 = vld [vmem:[%s3635_s12 + $0x380] sm:$0xf]  ;;  %450 = vst [vmem:[%s3642_s13 + $0x1b8] sm:$0xf] %v449_v46 }
  0x5f   : > { %452 = vst [vmem:[%s3642_s13 + $0x1bc] sm:$0xf] %v451_v47  ;;  %454 = vst [vmem:[%s3642_s13 + $0x1c0] sm:$0xf] %v453_v48  ;;  %v455_v49 = vld [vmem:[%s3635_s12 + $0x388] sm:$0xf] }
  0x60   : > { %v457_v50 = vld [vmem:[%s3635_s12 + $0x390] sm:$0xf]  ;;  %v459_v51 = vld [vmem:[%s3635_s12 + $0x398] sm:$0xf]  ;;  %456 = vst [vmem:[%s3642_s13 + $0x1c4] sm:$0xf] %v455_v49 }
  0x61   : > { %458 = vst [vmem:[%s3642_s13 + $0x1c8] sm:$0xf] %v457_v50  ;;  %460 = vst [vmem:[%s3642_s13 + $0x1cc] sm:$0xf] %v459_v51  ;;  %v461_v52 = vld [vmem:[%s3635_s12 + $0x3a0] sm:$0xf] }
  0x62   : > { %v463_v53 = vld [vmem:[%s3635_s12 + $0x3a8] sm:$0xf]  ;;  %v465_v54 = vld [vmem:[%s3635_s12 + $0x3b0] sm:$0xf]  ;;  %462 = vst [vmem:[%s3642_s13 + $0x1d0] sm:$0xf] %v461_v52 }
  0x63   : > { %464 = vst [vmem:[%s3642_s13 + $0x1d4] sm:$0xf] %v463_v53  ;;  %466 = vst [vmem:[%s3642_s13 + $0x1d8] sm:$0xf] %v465_v54  ;;  %v467_v55 = vld [vmem:[%s3635_s12 + $0x3b8] sm:$0xf] }
  0x64   : > { %v469_v56 = vld [vmem:[%s3635_s12 + $0x3c0] sm:$0xf]  ;;  %v471_v57 = vld [vmem:[%s3635_s12 + $0x3c8] sm:$0xf]  ;;  %468 = vst [vmem:[%s3642_s13 + $0x1dc] sm:$0xf] %v467_v55 }
  0x65   : > { %470 = vst [vmem:[%s3642_s13 + $0x1e0] sm:$0xf] %v469_v56  ;;  %472 = vst [vmem:[%s3642_s13 + $0x1e4] sm:$0xf] %v471_v57  ;;  %v473_v58 = vld [vmem:[%s3635_s12 + $0x3d0] sm:$0xf] }
  0x66   : > { %v475_v59 = vld [vmem:[%s3635_s12 + $0x3d8] sm:$0xf]  ;;  %v477_v60 = vld [vmem:[%s3635_s12 + $0x3e0] sm:$0xf]  ;;  %474 = vst [vmem:[%s3642_s13 + $0x1e8] sm:$0xf] %v473_v58 }
  0x67   : > { %476 = vst [vmem:[%s3642_s13 + $0x1ec] sm:$0xf] %v475_v59  ;;  %478 = vst [vmem:[%s3642_s13 + $0x1f0] sm:$0xf] %v477_v60  ;;  %v479_v61 = vld [vmem:[%s3635_s12 + $0x3e8] sm:$0xf] }
  0x68   : > { %v481_v62 = vld [vmem:[%s3635_s12 + $0x3f0] sm:$0xf]  ;;  %v483_v63 = vld [vmem:[%s3635_s12 + $0x3f8] sm:$0xf]  ;;  %480 = vst [vmem:[%s3642_s13 + $0x1f4] sm:$0xf] %v479_v61 }
  0x69   : > { %482 = vst [vmem:[%s3642_s13 + $0x1f8] sm:$0xf] %v481_v62  ;;  %484 = vst [vmem:[%s3642_s13 + $0x1fc] sm:$0xf] %v483_v63  ;;  %v485_v0 = vld [vmem:[%s3635_s12 + $0x400] sm:$0xf] }
  0x6a   : > { %v487_v1 = vld [vmem:[%s3635_s12 + $0x408] sm:$0xf]  ;;  %v489_v2 = vld [vmem:[%s3635_s12 + $0x410] sm:$0xf]  ;;  %486 = vst [vmem:[%s3642_s13 + $0x200] sm:$0xf] %v485_v0 }
  0x6b   : > { %488 = vst [vmem:[%s3642_s13 + $0x204] sm:$0xf] %v487_v1  ;;  %490 = vst [vmem:[%s3642_s13 + $0x208] sm:$0xf] %v489_v2  ;;  %v491_v3 = vld [vmem:[%s3635_s12 + $0x418] sm:$0xf] }
  0x6c   : > { %v493_v4 = vld [vmem:[%s3635_s12 + $0x420] sm:$0xf]  ;;  %v495_v5 = vld [vmem:[%s3635_s12 + $0x428] sm:$0xf]  ;;  %492 = vst [vmem:[%s3642_s13 + $0x20c] sm:$0xf] %v491_v3 }
  0x6d   : > { %494 = vst [vmem:[%s3642_s13 + $0x210] sm:$0xf] %v493_v4  ;;  %496 = vst [vmem:[%s3642_s13 + $0x214] sm:$0xf] %v495_v5  ;;  %v497_v6 = vld [vmem:[%s3635_s12 + $0x430] sm:$0xf] }
  0x6e   : > { %v499_v7 = vld [vmem:[%s3635_s12 + $0x438] sm:$0xf]  ;;  %v501_v8 = vld [vmem:[%s3635_s12 + $0x440] sm:$0xf]  ;;  %498 = vst [vmem:[%s3642_s13 + $0x218] sm:$0xf] %v497_v6 }
  0x6f   : > { %500 = vst [vmem:[%s3642_s13 + $0x21c] sm:$0xf] %v499_v7  ;;  %502 = vst [vmem:[%s3642_s13 + $0x220] sm:$0xf] %v501_v8  ;;  %v503_v9 = vld [vmem:[%s3635_s12 + $0x448] sm:$0xf] }
  0x70   : > { %v505_v10 = vld [vmem:[%s3635_s12 + $0x450] sm:$0xf]  ;;  %v507_v11 = vld [vmem:[%s3635_s12 + $0x458] sm:$0xf]  ;;  %504 = vst [vmem:[%s3642_s13 + $0x224] sm:$0xf] %v503_v9 }
  0x71   : > { %506 = vst [vmem:[%s3642_s13 + $0x228] sm:$0xf] %v505_v10  ;;  %508 = vst [vmem:[%s3642_s13 + $0x22c] sm:$0xf] %v507_v11  ;;  %v509_v12 = vld [vmem:[%s3635_s12 + $0x460] sm:$0xf] }
  0x72   : > { %v511_v13 = vld [vmem:[%s3635_s12 + $0x468] sm:$0xf]  ;;  %v513_v14 = vld [vmem:[%s3635_s12 + $0x470] sm:$0xf]  ;;  %510 = vst [vmem:[%s3642_s13 + $0x230] sm:$0xf] %v509_v12 }
  0x73   : > { %512 = vst [vmem:[%s3642_s13 + $0x234] sm:$0xf] %v511_v13  ;;  %514 = vst [vmem:[%s3642_s13 + $0x238] sm:$0xf] %v513_v14  ;;  %v515_v15 = vld [vmem:[%s3635_s12 + $0x478] sm:$0xf] }
  0x74   : > { %516 = vst [vmem:[%s3642_s13 + $0x23c] sm:$0xf] %v515_v15 }
  0x75 PF: > { %827 = sbr.rel (!%p3619_p4) target bundleno = 124 (0x7c), region = 77  ;;  %s829_s14 = sand.u32 (%p3619_p4), 1, %s3545_s22  }
  0x76   : > { %s2826_s15 = sshll.u32 (%p3619_p4), %s3549_s23, 2  ;;  %s2825_s16 = sshll.u32 (%p3619_p4), %s829_s14, 4 }
  0x77   : > { %s833_s19 = scalar_lea.vmem (%p3619_p4), %s4413_s5, %s2826_s15  ;;  %s831_s20 = scalar_lea.vmem (%p3619_p4), [#allocation3], %s2825_s16 }
  0x78   : > { %v849_v16 = vld [vmem:[%s833_s19] sm:$0xf] (%p3619_p4)  ;;  %v851_v17 = vld [vmem:[%s833_s19 + $0x8] sm:$0xf] (%p3619_p4)  ;;  %v853_v18 = vld [vmem:[%s833_s19 + $0x10] sm:$0xf] (%p3619_p4) }
  0x79   : > { %850 = vst [vmem:[%s831_s20] sm:$0xf] (%p3619_p4), %v849_v16  ;;  %852 = vst [vmem:[%s831_s20 + $0x4] sm:$0xf] (%p3619_p4), %v851_v17  ;;  %v855_v19 = vld [vmem:[%s833_s19 + $0x18] sm:$0xf] (%p3619_p4) }
  0x7a   : > { %854 = vst [vmem:[%s831_s20 + $0x8] sm:$0xf] (%p3619_p4), %v853_v18  ;;  %856 = vst [vmem:[%s831_s20 + $0xc] sm:$0xf] (%p3619_p4), %v855_v19 }
  0x7c PF: > { %p2827_p7 = scmp.ge.s32.totalorder %s3549_s23, 1  ;;  %p886_p8 = scmp.lt.s32.totalorder %s3549_s23, 3 }
  0x7e   : > { %p887_p9 = pnand %p2827_p7, %p886_p8 }
  0x7f   : > { %s893_s26 = sand.u32 (!%p887_p9), 1, %s3541_s21   ;;  %v3377_v20 = vld [vmem:[%s4409_s1 + $0x4] ss:$36 sps:$4 sm:$0xff] (!%p887_p9)   ;;  %v3551_v21 = vmov (!%p887_p9), 0   ;;  %v3381_v22 = vld [vmem:[%s4409_s1 + $0xc] ss:$36 sps:$4 sm:$0xff] (!%p887_p9)  }
  0x80   : > { %890 = sbr.rel (%p887_p9) target bundleno = 799 (0x31f), region = 118  ;;  %3342 = vset.pattern.permute.xlu0 (!%p887_p9), %v3551_v21  ;;  %3343 = vset.pattern.permute.xlu1 (!%p887_p9), %v3551_v21  ;;  %v3375_v52 = vld [vmem:[%s4409_s1] ss:$36 sps:$4 sm:$0xff] (!%p887_p9)   ;;  %v3382_v54 = vld [vmem:[%s4409_s1 + $0x4c] ss:$36 sps:$4 sm:$0xff] (!%p887_p9)   ;;  %vm3553_vm0 = vmmov (!%p887_p9), 0  }
  0x81   : > { %s3314_s27 = smul.u32 (!%p887_p9), 576, %s893_s26  ;;  %2085 = vmatprep.mubr.bf16.mxu0 (!%p887_p9), %v3377_v20  ;;  %2182 = vmatprep.mubr.bf16.mxu1 (!%p887_p9), %v3381_v22  ;;  %v3379_v57 = vld [vmem:[%s4409_s1 + $0x8] ss:$36 sps:$4 sm:$0xff] (!%p887_p9)   ;;  %v3385_v58 = vld [vmem:[%s4409_s1 + $0x54] ss:$36 sps:$4 sm:$0xff] (!%p887_p9)   ;;  %s4387_s20 = sshll.u32 (!%p887_p9), %s893_s26, 4 }
  0x82   : > { %v3384_v59 = vld [vmem:[%s4409_s1 + $0x48] ss:$36 sps:$4 sm:$0xff] (!%p887_p9)   ;;  %v3387_v60 = vld [vmem:[%s4409_s1 + $0x50] ss:$36 sps:$4 sm:$0xff] (!%p887_p9)   ;;  %v3391_v63 = vld [vmem:[%s4409_s1 + $0x9c] ss:$36 sps:$4 sm:$0xff] (!%p887_p9)  }
  0x83   : > { %s3945_s10 = scalar_lea.vmem (!%p887_p9), [#allocation2], %s3314_s27  ;;  %v3388_v61 = vld [vmem:[%s4409_s1 + $0x94] ss:$36 sps:$4 sm:$0xff] (!%p887_p9)   ;;  %v3394_v3 = vld [vmem:[%s4409_s1 + $0xdc] ss:$36 sps:$4 sm:$0xff] (!%p887_p9)   ;;  %s902_s27 = scalar_lea.vmem (!%p887_p9), [#allocation3], %s4387_s20 }
  0x84   : > { %v3344_v23 = vld [vmem:[%s3945_s10 + $0x40] sm:$0xff] (!%p887_p9)   ;;  %v3348_v27 = vld [vmem:[%s3945_s10 + $0x48] sm:$0xff] (!%p887_p9)   ;;  %v3352_v31 = vld [vmem:[%s3945_s10 + $0x50] sm:$0xff] (!%p887_p9)   ;;  %vm2690_vm1 = vcmask (!%p887_p9), 1042432   ;;  %vm2685_vm2 = vcmask (!%p887_p9), 1045504   ;;  %vm2693_vm3 = vcmask (!%p887_p9), 1040384  }
  0x85   : > { %v3345_v24 = vld [vmem:[%s3945_s10] sm:$0xff] (!%p887_p9)   ;;  %2980 = vmatprep.subr.bf16.mxu0 (!%p887_p9), %v3344_v23  ;;  %v3349_v28 = vld [vmem:[%s3945_s10 + $0x8] sm:$0xff] (!%p887_p9)   ;;  %v3353_v32 = vld [vmem:[%s3945_s10 + $0x10] sm:$0xff] (!%p887_p9)   ;;  %vm2695_vm4 = vcmask (!%p887_p9), 1043456   ;;  %vm2697_vm5 = vcmask (!%p887_p9), 1046528   ;;  %s931_s21 = scalar_lea.vmem (!%p887_p9), [#allocation4], %s4387_s20 }
  0x86   : > { %v3346_v25 = vld [vmem:[%s3945_s10 + $0xc0] sm:$0xff] (!%p887_p9)   ;;  %2981 = vmatpush3.bf16.msra.mxu0 (!%p887_p9), %v3345_v24  ;;  %v3350_v29 = vld [vmem:[%s3945_s10 + $0xc8] sm:$0xff] (!%p887_p9)   ;;  %v3354_v33 = vld [vmem:[%s3945_s10 + $0xd0] sm:$0xff] (!%p887_p9)  }
  0x87   : > { %v3347_v26 = vld [vmem:[%s3945_s10 + $0x80] sm:$0xff]   ;;  %3044 = vmatprep.subr.bf16.mxu1 %v3346_v25  ;;  %2982 = vmatprep.subr.bf16.mxu0 %v3348_v27  ;;  %v3351_v30 = vld [vmem:[%s3945_s10 + $0x88] sm:$0xff]   ;;  %v3355_v34 = vld [vmem:[%s3945_s10 + $0x90] sm:$0xff]   ;;  %s2977_s26 = sshll.u32 (%p3623_p5), %s2820_s24, 3 }
  0x88   : > { %3045 = vmatpush3.bf16.msra.mxu1 %v3347_v26  ;;  %v3356_v35 = vld [vmem:[%s3945_s10 + $0x58] sm:$0xff]   ;;  %v3360_v39 = vld [vmem:[%s3945_s10 + $0x60] sm:$0xff]   ;;  %v3364_v43 = vld [vmem:[%s3945_s10 + $0x68] sm:$0xff]   ;;  %s2709_s8 = scalar_lea.vmem (%p3623_p5), %s4414_s6, %s2977_s26 }
  0x89   : > { %3046 = vmatprep.subr.bf16.mxu1 %v3350_v29  ;;  %v3357_v36 = vld [vmem:[%s3945_s10 + $0x18] sm:$0xff]   ;;  %v3361_v40 = vld [vmem:[%s3945_s10 + $0x20] sm:$0xff]   ;;  %v3365_v44 = vld [vmem:[%s3945_s10 + $0x28] sm:$0xff]  }
  0x8a   : > { %2983 = vmatpush3.bf16.msra.mxu0 %v3349_v28  ;;  %v3358_v37 = vld [vmem:[%s3945_s10 + $0xd8] sm:$0xff]   ;;  %v3362_v41 = vld [vmem:[%s3945_s10 + $0xe0] sm:$0xff]   ;;  %v3366_v45 = vld [vmem:[%s3945_s10 + $0xe8] sm:$0xff]  }
  0x8b   : > { %2984 = vmatprep.subr.bf16.mxu0 %v3352_v31  ;;  %v3359_v38 = vld [vmem:[%s3945_s10 + $0x98] sm:$0xff]   ;;  %v3363_v42 = vld [vmem:[%s3945_s10 + $0xa0] sm:$0xff]   ;;  %v3367_v46 = vld [vmem:[%s3945_s10 + $0xa8] sm:$0xff]  }
  0x8c   : > { %3047 = vmatpush3.bf16.msra.mxu1 %v3351_v30  ;;  %v3368_v47 = vld [vmem:[%s3945_s10 + $0x70] sm:$0xff]   ;;  %v3372_v51 = vld [vmem:[%s3945_s10 + $0x78] sm:$0xff]   ;;  %v3403_v62 = vld [vmem:[%s3945_s10 + $0x140] sm:$0xff]  }
  0x8d   : > { %3048 = vmatprep.subr.bf16.mxu1 %v3354_v33  ;;  %v3369_v48 = vld [vmem:[%s3945_s10 + $0x30] sm:$0xff]   ;;  %v3373_v53 = vld [vmem:[%s3945_s10 + $0x38] sm:$0xff]   ;;  %v3406_v0 = vld [vmem:[%s3945_s10 + $0x100] sm:$0xff]  }
  0x8e   : > { %2985 = vmatpush3.bf16.msra.mxu0 %v3353_v32  ;;  %v3370_v49 = vld [vmem:[%s3945_s10 + $0xf0] sm:$0xff]   ;;  %v3374_v55 = vld [vmem:[%s3945_s10 + $0xf8] sm:$0xff]   ;;  %v3408_v2 = vld [vmem:[%s3945_s10 + $0x1c0] sm:$0xff]  }
  0x8f   : > { %2986 = vmatprep.subr.bf16.mxu0 %v3356_v35  ;;  %v3371_v50 = vld [vmem:[%s3945_s10 + $0xb0] sm:$0xff]   ;;  %v3378_v56 = vld [vmem:[%s3945_s10 + $0xb8] sm:$0xff]   ;;  %v3409_v4 = vld [vmem:[%s3945_s10 + $0x180] sm:$0xff]  }
  0x90   : > { %3049 = vmatpush3.bf16.msra.mxu1 %v3355_v34  ;;  %v3390_v1 = vld [vmem:[%s4409_s1 + $0x90] ss:$36 sps:$4 sm:$0xff]   ;;  %v3393_v5 = vld [vmem:[%s4409_s1 + $0x98] ss:$36 sps:$4 sm:$0xff]   ;;  %v3410_v6 = vld [vmem:[%s3945_s10 + $0x148] sm:$0xff]  }
  0x91   : > { %3050 = vmatprep.subr.bf16.mxu1 %v3358_v37  ;;  %v3411_v7 = vld [vmem:[%s3945_s10 + $0x108] sm:$0xff]   ;;  %v3417_v11 = vld [vmem:[%s3945_s10 + $0x150] sm:$0xff]   ;;  %v3396_v12 = vld [vmem:[%s4409_s1 + $0xd8] ss:$36 sps:$4 sm:$0xff]  }
  0x92   : > { %2987 = vmatpush3.bf16.msra.mxu0 %v3357_v36  ;;  %v3412_v8 = vld [vmem:[%s3945_s10 + $0x1c8] sm:$0xff]   ;;  %v3420_v14 = vld [vmem:[%s3945_s10 + $0x110] sm:$0xff]   ;;  %v3399_v15 = vld [vmem:[%s4409_s1 + $0xe0] ss:$36 sps:$4 sm:$0xff]  }
  0x93   : > { %2988 = vmatprep.subr.bf16.mxu0 %v3360_v39  ;;  %v3397_v9 = vld [vmem:[%s4409_s1 + $0xe4] ss:$36 sps:$4 sm:$0xff]   ;;  %v3422_v16 = vld [vmem:[%s3945_s10 + $0x1d0] sm:$0xff]   ;;  %v3424_v19 = vld [vmem:[%s3945_s10 + $0x158] sm:$0xff]  }
  0x94   : > { %3051 = vmatpush3.bf16.msra.mxu1 %v3359_v38  ;;  %v3415_v10 = vld [vmem:[%s3945_s10 + $0x188] sm:$0xff]   ;;  %v3423_v18 = vld [vmem:[%s3945_s10 + $0x190] sm:$0xff]   ;;  %v3425_v20 = vld [vmem:[%s3945_s10 + $0x118] sm:$0xff]  }
  0x95   : > { %3052 = vmatprep.subr.bf16.mxu1 %v3362_v41  ;;  %v3400_v13 = vld [vmem:[%s4409_s1 + $0x124] ss:$36 sps:$4 sm:$0xff]   ;;  %v3404_v17 = vld [vmem:[%s4409_s1 + $0x12c] ss:$36 sps:$4 sm:$0xff]   ;;  %v3426_v21 = vld [vmem:[%s3945_s10 + $0x1d8] sm:$0xff]  }
  0x96   : > { %2989 = vmatpush3.bf16.msra.mxu0 %v3361_v40  ;;  %v3429_v22 = vld [vmem:[%s3945_s10 + $0x198] sm:$0xff]   ;;  %v3402_v23 = vld [vmem:[%s4409_s1 + $0x120] ss:$36 sps:$4 sm:$0xff]   ;;  %v3407_v24 = vld [vmem:[%s4409_s1 + $0x128] ss:$36 sps:$4 sm:$0xff]  }
  0x97   : > { %2990 = vmatprep.subr.bf16.mxu0 %v3364_v43  ;;  %v3431_v25 = vld [vmem:[%s3945_s10 + $0x160] sm:$0xff]   ;;  %v3413_v26 = vld [vmem:[%s4409_s1 + $0x16c] ss:$36 sps:$4 sm:$0xff]   ;;  %v3418_v27 = vld [vmem:[%s4409_s1 + $0x174] ss:$36 sps:$4 sm:$0xff]  }
  0x98   : > { %3053 = vmatpush3.bf16.msra.mxu1 %v3363_v42  ;;  %v3434_v28 = vld [vmem:[%s3945_s10 + $0x120] sm:$0xff]   ;;  %v3438_v31 = vld [vmem:[%s3945_s10 + $0x168] sm:$0xff]   ;;  %v3421_v35 = vld [vmem:[%s4409_s1 + $0x170] ss:$36 sps:$4 sm:$0xff]  }
  0x99   : > { %3054 = vmatprep.subr.bf16.mxu1 %v3366_v45  ;;  %v3436_v29 = vld [vmem:[%s3945_s10 + $0x1e0] sm:$0xff]   ;;  %v3416_v32 = vld [vmem:[%s4409_s1 + $0x168] ss:$36 sps:$4 sm:$0xff]   ;;  %v3427_v36 = vld [vmem:[%s4409_s1 + $0x1b4] ss:$36 sps:$4 sm:$0xff]  }
  0x9a   : > { %2991 = vmatpush3.bf16.msra.mxu0 %v3365_v44  ;;  %v3437_v30 = vld [vmem:[%s3945_s10 + $0x1a0] sm:$0xff]   ;;  %v3439_v33 = vld [vmem:[%s3945_s10 + $0x128] sm:$0xff]   ;;  %v3445_v38 = vld [vmem:[%s3945_s10 + $0x170] sm:$0xff]  }
  0x9b   : > { %2992 = vmatprep.subr.bf16.mxu0 %v3368_v47  ;;  %v3440_v34 = vld [vmem:[%s3945_s10 + $0x1e8] sm:$0xff]   ;;  %v3432_v39 = vld [vmem:[%s4409_s1 + $0x1bc] ss:$36 sps:$4 sm:$0xff]   ;;  %v3448_v40 = vld [vmem:[%s3945_s10 + $0x130] sm:$0xff]  }
  0x9c   : > { %3055 = vmatpush3.bf16.msra.mxu1 %v3367_v46  ;;  %v3443_v37 = vld [vmem:[%s3945_s10 + $0x1a8] sm:$0xff]   ;;  %v3430_v41 = vld [vmem:[%s4409_s1 + $0x1b0] ss:$36 sps:$4 sm:$0xff]   ;;  %v3441_v43 = vld [vmem:[%s4409_s1 + $0x1fc] ss:$36 sps:$4 sm:$0xff]  }
  0x9d   : > { %3056 = vmatprep.subr.bf16.mxu1 %v3370_v49  ;;  %v3450_v42 = vld [vmem:[%s3945_s10 + $0x1f0] sm:$0xff]   ;;  %v3435_v45 = vld [vmem:[%s4409_s1 + $0x1b8] ss:$36 sps:$4 sm:$0xff]   ;;  %v3446_v49 = vld [vmem:[%s4409_s1 + $0x204] ss:$36 sps:$4 sm:$0xff]  }
  0x9e   : > { %2993 = vmatpush3.bf16.msra.mxu0 %v3369_v48  ;;  %v3451_v44 = vld [vmem:[%s3945_s10 + $0x1b0] sm:$0xff]   ;;  %v3452_v46 = vld [vmem:[%s3945_s10 + $0x178] sm:$0xff]  }
  0x9f   : > { %2994 = vmatprep.subr.bf16.mxu0 %v3372_v51  ;;  %v3453_v47 = vld [vmem:[%s3945_s10 + $0x138] sm:$0xff]  }
  0xa0   : > { %3057 = vmatpush3.bf16.msra.mxu1 %v3371_v50  ;;  %v3454_v48 = vld [vmem:[%s3945_s10 + $0x1f8] sm:$0xff]  }
  0xa1   : > { %3058 = vmatprep.subr.bf16.mxu1 %v3374_v55  ;;  %v3458_v50 = vld [vmem:[%s3945_s10 + $0x1b8] sm:$0xff]   ;;  %v1157_v55 = vld [vmem:[%s4410_s2] sm:$0xff] }
  0xa2   : > { %2995 = vmatpush3.bf16.msra.mxu0 %v3373_v53  ;;  %v3444_v51 = vld [vmem:[%s4409_s1 + $0x1f8] ss:$36 sps:$4 sm:$0xff]   ;;  %v3449_v53 = vld [vmem:[%s4409_s1 + $0x200] ss:$36 sps:$4 sm:$0xff]   ;;  %1175 = vperm.xlu0 %3342, %v1157_v55  }
  0xa3   : > { %3108 = vmatprep.subr.bf16.mxu0 %v3403_v62  ;;  %v3459_v62 = vld [vmem:[%s4409_s1 + $0x18] ss:$36 sps:$4 sm:$0xff]  }
  0xa4   : > { %3059 = vmatpush3.bf16.msra.mxu1 %v3378_v56  ;;  %v1158_v56 = vld [vmem:[%s4410_s2 + $0x8] sm:$0xff] }
  0xa5   : > { %2086 = vmatmul.mubr.bf16.vlgmr.msra.gmra.mrb[0].mxu0 %v3375_v52  ;;  %3172 = vmatprep.subr.bf16.mxu1 %v3408_v2  ;;  %v3457_v52 = vld [vmem:[%s4409_s1 + $0x14] ss:$36 sps:$4 sm:$0xff]  }
  0xa6   : > { %2093 = vmatprep.mubr.bf16.mxu0 %v3382_v54  ;;  %3109 = vmatpush3.bf16.msra.mxu0 %v3406_v0  ;;  %v3461_v54 = vld [vmem:[%s4409_s1 + $0x1c] ss:$36 sps:$4 sm:$0xff]   ;;  %v3487_v0 = vld [vmem:[%s3945_s10 + $0x208] sm:$0xff]   ;;  %v3491_v2 = vld [vmem:[%s3945_s10 + $0x210] sm:$0xff]  }
  0xa7   : > { %2183 = vmatmul.mubr.bf16.vlgmr.msra.gmra.mrb[0].mxu1 %v3379_v57  ;;  %3110 = vmatprep.subr.bf16.mxu0 %v3410_v6  ;;  %v1159_v57 = vld [vmem:[%s4410_s2 + $0x10] sm:$0xff] }
  0xa8   : > { %2190 = vmatprep.mubr.bf16.mxu1 %v3385_v58  ;;  %3173 = vmatpush3.bf16.msra.mxu1 %v3409_v4  ;;  %v3455_v58 = vld [vmem:[%s4409_s1 + $0x10] ss:$36 sps:$4 sm:$0xff]   ;;  %v3464_v4 = vld [vmem:[%s4409_s1 + $0x58] ss:$36 sps:$4 sm:$0xff]  }
  0xa9   : > { %3174 = vmatprep.subr.bf16.mxu1 %v3412_v8  ;;  %1185 = vperm.xlu1 %3343, %v1159_v57   ;;  %v1163_v6 = vld [vmem:[%s4410_s2 + $0x30] sm:$0xff]  ;;  %v3495_v8 = vld [vmem:[%s3945_s10 + $0x218] sm:$0xff]  }
  0xaa   : > { %3111 = vmatpush3.bf16.msra.mxu0 %v3411_v7  ;;  %1180 = vperm.xlu0 %3342, %v1158_v56   ;;  %v3467_v7 = vld [vmem:[%s4409_s1 + $0x60] ss:$36 sps:$4 sm:$0xff]  }
  0xab   : > { %3112 = vmatprep.subr.bf16.mxu0 %v3417_v11  ;;  %v3499_v11 = vld [vmem:[%s3945_s10 + $0x220] sm:$0xff]  }
  0xac   : > { %3175 = vmatpush3.bf16.msra.mxu1 %v3415_v10  ;;  %v1164_v10 = vld [vmem:[%s4410_s2 + $0x38] sm:$0xff] }
  0xad   : > { %2094 = vmatmul.mubr.bf16.gmra.mrb[4].mxu0 %v3384_v59  ;;  %3176 = vmatprep.subr.bf16.mxu1 %v3422_v16  ;;  %v3462_v59 = vld [vmem:[%s4409_s1 + $0x5c] ss:$36 sps:$4 sm:$0xff]   ;;  %v3473_v16 = vld [vmem:[%s4409_s1 + $0xa8] ss:$36 sps:$4 sm:$0xff]  }
  0xae   : > { %2101 = vmatprep.mubr.bf16.mxu0 %v3388_v61  ;;  %3113 = vmatpush3.bf16.msra.mxu0 %v3420_v14  ;;  %v1160_v61 = vld [vmem:[%s4410_s2 + $0x18] sm:$0xff]  ;;  %v3474_v14 = vld [vmem:[%s4409_s1 + $0xec] ss:$36 sps:$4 sm:$0xff]  }
  0xaf   : > { %2191 = vmatmul.mubr.bf16.gmra.mrb[4].mxu1 %v3387_v60  ;;  %3114 = vmatprep.subr.bf16.mxu0 %v3424_v19  ;;  %v3483_v60 = vld [vmem:[%s3945_s10 + $0x200] sm:$0xff]   ;;  %v1167_v19 = vld [vmem:[%s4410_s2 + $0x50] sm:$0xff] }
  0xb0   : > { %2198 = vmatprep.mubr.bf16.mxu1 %v3391_v63  ;;  %3177 = vmatpush3.bf16.msra.mxu1 %v3423_v18  ;;  %v3465_v63 = vld [vmem:[%s4409_s1 + $0x64] ss:$36 sps:$4 sm:$0xff]   ;;  %v3477_v18 = vld [vmem:[%s4409_s1 + $0xf4] ss:$36 sps:$4 sm:$0xff]  }
  0xb1   : > { %3178 = vmatprep.subr.bf16.mxu1 %v3426_v21  ;;  %1190 = vperm.xlu1 %3343, %v1160_v61   ;;  %v1168_v21 = vld [vmem:[%s4410_s2 + $0x58] sm:$0xff] }
  0xb2   : > { %3115 = vmatpush3.bf16.msra.mxu0 %v3425_v20  ;;  %v3507_v20 = vld [vmem:[%s3945_s10 + $0x230] sm:$0xff]  }
  0xb3   : > { %3116 = vmatprep.subr.bf16.mxu0 %v3431_v25  ;;  %v3480_v25 = vld [vmem:[%s4409_s1 + $0x134] ss:$36 sps:$4 sm:$0xff]  }
  0xb4   : > { %3179 = vmatpush3.bf16.msra.mxu1 %v3429_v22  ;;  %v3476_v22 = vld [vmem:[%s4409_s1 + $0xe8] ss:$36 sps:$4 sm:$0xff]  }
  0xb5   : > { %2102 = vmatmul.mubr.bf16.gmra.mrb[8].mxu0 %v3390_v1  ;;  %3180 = vmatprep.subr.bf16.mxu1 %v3436_v29  ;;  %v1161_v1 = vld [vmem:[%s4410_s2 + $0x20] sm:$0xff]  ;;  %v1171_v29 = vld [vmem:[%s4410_s2 + $0x70] sm:$0xff] }
  0xb6   : > { %2109 = vmatprep.mubr.bf16.mxu0 %v3394_v3  ;;  %3117 = vmatpush3.bf16.msra.mxu0 %v3434_v28  ;;  %v1162_v3 = vld [vmem:[%s4410_s2 + $0x28] sm:$0xff]  ;;  %v3484_v28 = vld [vmem:[%s4409_s1 + $0x13c] ss:$36 sps:$4 sm:$0xff]  }
  0xb7   : > { %2199 = vmatmul.mubr.bf16.gmra.mrb[8].mxu1 %v3393_v5  ;;  %3118 = vmatprep.subr.bf16.mxu0 %v3438_v31  ;;  %v3468_v5 = vld [vmem:[%s4409_s1 + $0xa4] ss:$36 sps:$4 sm:$0xff]   ;;  %v3482_v31 = vld [vmem:[%s4409_s1 + $0x130] ss:$36 sps:$4 sm:$0xff]  }
  0xb8   : > { %2206 = vmatprep.mubr.bf16.mxu1 %v3397_v9  ;;  %3181 = vmatpush3.bf16.msra.mxu1 %v3437_v30  ;;  %v3471_v9 = vld [vmem:[%s4409_s1 + $0xac] ss:$36 sps:$4 sm:$0xff]   ;;  %v1172_v30 = vld [vmem:[%s4410_s2 + $0x78] sm:$0xff] }
  0xb9   : > { %3182 = vmatprep.subr.bf16.mxu1 %v3440_v34  ;;  %1195 = vperm.xlu0 %3342, %v1161_v1   ;;  %v2565_v34 = vld [vmem:[%s4412_s4 + $0x8] sm:$0xff] }
  0xba   : > { %3119 = vmatpush3.bf16.msra.mxu0 %v3439_v33  ;;  %1200 = vperm.xlu1 %3343, %v1162_v3   ;;  %v3488_v33 = vld [vmem:[%s4409_s1 + $0x17c] ss:$36 sps:$4 sm:$0xff]  }
  0xbb   : > { %3120 = vmatprep.subr.bf16.mxu0 %v3445_v38  ;;  %v3496_v38 = vld [vmem:[%s4409_s1 + $0x1c4] ss:$36 sps:$4 sm:$0xff]  }
  0xbc   : > { %3183 = vmatpush3.bf16.msra.mxu1 %v3443_v37  ;;  %v3490_v37 = vld [vmem:[%s4409_s1 + $0x178] ss:$36 sps:$4 sm:$0xff]  }
  0xbd   : > { %2110 = vmatmul.mubr.bf16.gmra.mrb[12].mxu0 %v3396_v12  ;;  %3184 = vmatprep.subr.bf16.mxu1 %v3450_v42  ;;  %v1165_v12 = vld [vmem:[%s4410_s2 + $0x40] sm:$0xff]  ;;  %v3504_v42 = vld [vmem:[%s4409_s1 + $0x20c] ss:$36 sps:$4 sm:$0xff]  }
  0xbe   : > { %2117 = vmatprep.mubr.bf16.mxu0 %v3400_v13  ;;  %3121 = vmatpush3.bf16.msra.mxu0 %v3448_v40  ;;  %v3470_v13 = vld [vmem:[%s4409_s1 + $0xa0] ss:$36 sps:$4 sm:$0xff]   ;;  %v3500_v40 = vld [vmem:[%s4409_s1 + $0x1cc] ss:$36 sps:$4 sm:$0xff]  }
  0xbf   : > { %2207 = vmatmul.mubr.bf16.gmra.mrb[12].mxu1 %v3399_v15  ;;  %3122 = vmatprep.subr.bf16.mxu0 %v3452_v46  ;;  %v1166_v15 = vld [vmem:[%s4410_s2 + $0x48] sm:$0xff]  ;;  %v3512_v46 = vld [vmem:[%s4409_s1 + $0x20] ss:$36 sps:$4 sm:$0xff]  }
  0xc0   : > { %2214 = vmatprep.mubr.bf16.mxu1 %v3404_v17  ;;  %3185 = vmatpush3.bf16.msra.mxu1 %v3451_v44  ;;  %v3503_v17 = vld [vmem:[%s3945_s10 + $0x228] sm:$0xff]   ;;  %v3508_v44 = vld [vmem:[%s4409_s1 + $0x214] ss:$36 sps:$4 sm:$0xff]  }
  0xc1   : > { %3186 = vmatprep.subr.bf16.mxu1 %v3454_v48  ;;  %1205 = vperm.xlu0 %3342, %v1163_v6   ;;  %v3513_v48 = vld [vmem:[%s4409_s1 + $0x68] ss:$36 sps:$4 sm:$0xff]  }
  0xc2   : > { %3123 = vmatpush3.bf16.msra.mxu0 %v3453_v47  ;;  %1210 = vperm.xlu1 %3343, %v1164_v10   ;;  %v3510_v47 = vld [vmem:[%s4409_s1 + $0x210] ss:$36 sps:$4 sm:$0xff]  }
  0xc3   : > { %3261 = vmatprep.subr.bf16.mxu0 %v3483_v60 }
  0xc4   : > { %3187 = vmatpush3.bf16.msra.mxu1 %v3458_v50  ;;  %v3515_v50 = vld [vmem:[%s4409_s1 + $0xf8] ss:$36 sps:$4 sm:$0xff]  }
  0xc5   : > { %2118 = vmatmul.mubr.bf16.gmra.mrb[16].mxu0 %v3402_v23  ;;  %1215 = vperm.xlu0 %3342, %v1165_v12   ;;  %v3479_v23 = vld [vmem:[%s4409_s1 + $0xf0] ss:$36 sps:$4 sm:$0xff]  }
  0xc6   : > { %2125 = vmatprep.mubr.bf16.mxu0 %v3413_v26  ;;  %1220 = vperm.xlu1 %3343, %v1166_v15   ;;  %v1170_v26 = vld [vmem:[%s4410_s2 + $0x68] sm:$0xff] }
  0xc7   : > { %2215 = vmatmul.mubr.bf16.gmra.mrb[16].mxu1 %v3407_v24  ;;  %v1169_v24 = vld [vmem:[%s4410_s2 + $0x60] sm:$0xff] }
  0xc8   : > { %2222 = vmatprep.mubr.bf16.mxu1 %v3418_v27  ;;  %v3511_v27 = vld [vmem:[%s3945_s10 + $0x238] sm:$0xff]  }
  0xc9   : > { %1225 = vperm.xlu0 %3342, %v1167_v19  }
  0xca   : > { %1230 = vperm.xlu1 %3343, %v1168_v21  }
  0xcd   : > { %2126 = vmatmul.mubr.bf16.gmra.mrb[20].mxu0 %v3416_v32  ;;  %1235 = vperm.xlu0 %3342, %v1169_v24   ;;  %v2564_v32 = vld [vmem:[%s4412_s4] sm:$0xff] }
  0xce   : > { %2133 = vmatprep.mubr.bf16.mxu0 %v3427_v36  ;;  %1240 = vperm.xlu1 %3343, %v1170_v26   ;;  %v3492_v36 = vld [vmem:[%s4409_s1 + $0x184] ss:$36 sps:$4 sm:$0xff]  }
  0xcf   : > { %2223 = vmatmul.mubr.bf16.gmra.mrb[20].mxu1 %v3421_v35  ;;  %v3486_v35 = vld [vmem:[%s4409_s1 + $0x138] ss:$36 sps:$4 sm:$0xff]  }
  0xd0   : > { %2230 = vmatprep.mubr.bf16.mxu1 %v3432_v39  ;;  %v3494_v39 = vld [vmem:[%s4409_s1 + $0x180] ss:$36 sps:$4 sm:$0xff]  }
  0xd1   : > { %1245 = vperm.xlu0 %3342, %v1171_v29  }
  0xd2   : > { %1250 = vperm.xlu1 %3343, %v1172_v30  }
  0xd5   : > { %2134 = vmatmul.mubr.bf16.gmra.mrb[24].mxu0 %v3430_v41  ;;  %2568 = vperm.xlu0 %3342, %v2564_v32   ;;  %v3498_v41 = vld [vmem:[%s4409_s1 + $0x1c0] ss:$36 sps:$4 sm:$0xff]  }
  0xd6   : > { %2141 = vmatprep.mubr.bf16.mxu0 %v3441_v43  ;;  %2573 = vperm.xlu1 %3343, %v2565_v34   ;;  %v3502_v43 = vld [vmem:[%s4409_s1 + $0x1c8] ss:$36 sps:$4 sm:$0xff]  }
  0xd7   : > { %2231 = vmatmul.mubr.bf16.gmra.mrb[24].mxu1 %v3435_v45  ;;  %v3506_v45 = vld [vmem:[%s4409_s1 + $0x208] ss:$36 sps:$4 sm:$0xff]  }
  0xd8   : > { %2238 = vmatprep.mubr.bf16.mxu1 %v3446_v49  ;;  %v3514_v49 = vld [vmem:[%s4409_s1 + $0xb0] ss:$36 sps:$4 sm:$0xff]  }
  0xdd   : > { %2142 = vmatmul.mubr.bf16.gmra.mrb[28].mxu0 %v3444_v51  ;;  %v3516_v51 = vld [vmem:[%s4409_s1 + $0x140] ss:$36 sps:$4 sm:$0xff]  }
  0xde   : > { %2279 = vmatprep.mubr.bf16.mxu0 %v3457_v52  ;;  %v3517_v52 = vld [vmem:[%s4409_s1 + $0x188] ss:$36 sps:$4 sm:$0xff]  }
  0xdf   : > { %2239 = vmatmul.mubr.bf16.gmra.mrb[28].mxu1 %v3449_v53  ;;  %v3518_v53 = vld [vmem:[%s4409_s1 + $0x1d0] ss:$36 sps:$4 sm:$0xff]  }
  0xe0   : > { %2376 = vmatprep.mubr.bf16.mxu1 %v3461_v54  ;;  %v3519_v54 = vld [vmem:[%s4409_s1 + $0x218] ss:$36 sps:$4 sm:$0xff]  }
  0xe5   : > { %2280 = vmatmul.mubr.bf16.vlgmr.msra.gmra.mrb[32].mxu0 %v3455_v58 }
  0xe6   : > { %2287 = vmatprep.mubr.bf16.mxu0 %v3462_v59  ;;  %3262 = vmatpush3.bf16.msra.mxu0 %v3483_v60 }
  0xe7   : > { %2377 = vmatmul.mubr.bf16.vlgmr.msra.gmra.mrb[32].mxu1 %v3459_v62  ;;  %3263 = vmatprep.subr.bf16.mxu0 %v3487_v0 }
  0xe8   : > { %2384 = vmatprep.mubr.bf16.mxu1 %v3465_v63 }
  0xea   : > { %3264 = vmatpush3.bf16.msra.mxu0 %v3487_v0 }
  0xeb   : > { %3265 = vmatprep.subr.bf16.mxu0 %v3491_v2 }
  0xed   : > { %2288 = vmatmul.mubr.bf16.gmra.mrb[36].mxu0 %v3464_v4 }
  0xee   : > { %2295 = vmatprep.mubr.bf16.mxu0 %v3468_v5  ;;  %3266 = vmatpush3.bf16.msra.mxu0 %v3491_v2 }
  0xef   : > { %2385 = vmatmul.mubr.bf16.gmra.mrb[36].mxu1 %v3467_v7  ;;  %3267 = vmatprep.subr.bf16.mxu0 %v3495_v8 }
  0xf0   : > { %2392 = vmatprep.mubr.bf16.mxu1 %v3471_v9 }
  0xf2   : > { %3268 = vmatpush3.bf16.msra.mxu0 %v3495_v8 }
  0xf3   : > { %3269 = vmatprep.subr.bf16.mxu0 %v3499_v11 }
  0xf5   : > { %2296 = vmatmul.mubr.bf16.gmra.mrb[40].mxu0 %v3470_v13  ;;  %v3552_v13 = vmov 0.0  }
  0xf6   : > { %2303 = vmatprep.mubr.bf16.mxu0 %v3474_v14  ;;  %3270 = vmatpush3.bf16.msra.mxu0 %v3499_v11 }
  0xf7   : > { %2393 = vmatmul.mubr.bf16.gmra.mrb[40].mxu1 %v3473_v16  ;;  %3271 = vmatprep.subr.bf16.mxu0 %v3503_v17 }
  0xf8   : > { %2400 = vmatprep.mubr.bf16.mxu1 %v3477_v18  ;;  %3293 = vmatprep.subr.bf16.mxu1 %v3552_v13 }
  0xfa   : > { %3272 = vmatpush3.bf16.msra.mxu0 %v3503_v17 }
  0xfb   : > { %3273 = vmatprep.subr.bf16.mxu0 %v3507_v20 }
  0xfd   : > { %2304 = vmatmul.mubr.bf16.gmra.mrb[44].mxu0 %v3476_v22 }
  0xfe   : > { %2311 = vmatprep.mubr.bf16.mxu0 %v3480_v25  ;;  %3274 = vmatpush3.bf16.msra.mxu0 %v3507_v20 }
  0xff   : > { %2401 = vmatmul.mubr.bf16.gmra.mrb[44].mxu1 %v3479_v23  ;;  %3275 = vmatprep.subr.bf16.mxu0 %v3511_v27 }
 0x100   : > { %2408 = vmatprep.mubr.bf16.mxu1 %v3484_v28 }
 0x102   : > { %3276 = vmatpush3.bf16.msra.mxu0 %v3511_v27 }
 0x105   : > { %2312 = vmatmul.mubr.bf16.gmra.mrb[48].mxu0 %v3482_v31 }
 0x106   : > { %2319 = vmatprep.mubr.bf16.mxu0 %v3488_v33 }
 0x107   : > { %2409 = vmatmul.mubr.bf16.gmra.mrb[48].mxu1 %v3486_v35 }
 0x108   : > { %2416 = vmatprep.mubr.bf16.mxu1 %v3492_v36 }
 0x10d   : > { %2320 = vmatmul.mubr.bf16.gmra.mrb[52].mxu0 %v3490_v37 }
 0x10e   : > { %2327 = vmatprep.mubr.bf16.mxu0 %v3496_v38 }
 0x10f   : > { %2417 = vmatmul.mubr.bf16.gmra.mrb[52].mxu1 %v3494_v39 }
 0x110   : > { %2424 = vmatprep.mubr.bf16.mxu1 %v3500_v40 }
 0x115   : > { %2328 = vmatmul.mubr.bf16.gmra.mrb[56].mxu0 %v3498_v41 }
 0x116   : > { %2335 = vmatprep.mubr.bf16.mxu0 %v3504_v42 }
 0x117   : > { %2425 = vmatmul.mubr.bf16.gmra.mrb[56].mxu1 %v3502_v43 }
 0x118   : > { %2432 = vmatprep.mubr.bf16.mxu1 %v3508_v44 }
 0x11d   : > { %2336 = vmatmul.mubr.bf16.gmra.mrb[60].mxu0 %v3506_v45 }
 0x11e   : > { %3277 = vmatprep.mubr.bf16.mxu0 %v3512_v46 }
 0x11f   : > { %2433 = vmatmul.mubr.bf16.gmra.mrb[60].mxu1 %v3510_v47 }
 0x120   : > { %3309 = vmatprep.mubr.msk.bf16.mxu1 %vm3553_vm0, %v3552_v13 }
 0x121   : > { %v1176_v55 = vpop.permute.xlu0 %1175 }
 0x125   : > { %3278 = vmatmul.mubr.bf16.vlgmr.msra.gmra.mrb[64].mxu0 %v3513_v48 }
 0x126   : > { %3281 = vmatprep.mubr.bf16.mxu0 %v3514_v49 }
 0x128   : > { %v1186_v57 = vpop.permute.xlu1 %1185 }
 0x129   : > { %v1181_v59 = vpop.permute.xlu0 %1180 }
 0x12d   : > { %3282 = vmatmul.mubr.bf16.gmra.mrb[68].mxu0 %v3515_v50 }
 0x12e   : > { %3285 = vmatprep.mubr.bf16.mxu0 %v3516_v51 }
 0x130   : > { %v1191_v12 = vpop.permute.xlu1 %1190 }
 0x135   : > { %3286 = vmatmul.mubr.bf16.gmra.mrb[72].mxu0 %v3517_v52 }
 0x136   : > { %3289 = vmatprep.mubr.bf16.mxu0 %v3518_v53 }
 0x138   : > { %v1196_v29 = vpop.permute.xlu0 %1195 }
 0x139   : > { %v1201_v31 = vpop.permute.xlu1 %1200 }
 0x13d   : > { %3290 = vmatmul.mubr.bf16.gmra.mrb[76].mxu0 %v3519_v54 }
 0x140   : > { %v1206_v47 = vpop.permute.xlu0 %1205 }
 0x141   : > { %v1211_v49 = vpop.permute.xlu1 %1210 }
 0x178   : > { %v2996_v56 = vpop.f32.mrb[0].mxu0 }
 0x179   : > { %v2997_v58 = vpop.f32.mrb[1].mxu0 }
 0x17a   : > { %v2998_v60 = vadd.f32 %v2997_v58, %v2996_v56  ;;  %v2999_v61 = vpop.f32.mrb[2].mxu0  ;;  %v3060_v62 = vpop.f32.mrb[0].mxu1 }
 0x17b   : > { %v3000_v63 = vpop.f32.mrb[3].mxu0  ;;  %v3061_v0 = vpop.f32.mrb[1].mxu1 }
 0x17c   : > { %v2088_v1 = vadd.f32 %v2998_v60, %v1176_v55  ;;  %v3001_v2 = vadd.f32 %v3000_v63, %v2999_v61  ;;  %v3062_v3 = vadd.f32 %v3061_v0, %v3060_v62  ;;  %v3063_v4 = vpop.f32.mrb[2].mxu1 }
 0x17d   : > { %v3064_v5 = vpop.f32.mrb[3].mxu1 }
 0x17e   : > { %v4283_v6 = vadd.f32 %v3062_v3, %v2088_v1  ;;  %v2091_v7 = vadd.f32 %v3001_v2, %v1181_v59  ;;  %v3065_v8 = vadd.f32 %v3064_v5, %v3063_v4  ;;  %v1216_v1 = vpop.permute.xlu0 %1215  ;;  %v1221_v3 = vpop.permute.xlu1 %1220 }
 0x180   : > { %v4285_v9 = vadd.f32 %v3065_v8, %v2091_v7  ;;  %v3002_v10 = vpop.f32.mrb[4].mxu0 }
 0x181   : > { %v3003_v11 = vpop.f32.mrb[5].mxu0 }
 0x182   : > { %v3004_v14 = vadd.f32 %v3003_v11, %v3002_v10  ;;  %v3005_v15 = vpop.f32.mrb[6].mxu0  ;;  %v3066_v16 = vpop.f32.mrb[4].mxu1 }
 0x183   : > { %v3006_v17 = vpop.f32.mrb[7].mxu0  ;;  %v3067_v18 = vpop.f32.mrb[5].mxu1 }
 0x184   : > { %v2096_v19 = vadd.f32 %v3004_v14, %v1186_v57  ;;  %v3007_v20 = vadd.f32 %v3006_v17, %v3005_v15  ;;  %v3068_v21 = vadd.f32 %v3067_v18, %v3066_v16  ;;  %v3069_v22 = vpop.f32.mrb[6].mxu1 }
 0x185   : > { %v3070_v23 = vpop.f32.mrb[7].mxu1 }
 0x186   : > { %v4288_v24 = vadd.f32 %v3068_v21, %v2096_v19  ;;  %v2099_v25 = vadd.f32 %v3007_v20, %v1191_v12  ;;  %v3071_v26 = vadd.f32 %v3070_v23, %v3069_v22  ;;  %v1226_v22 = vpop.permute.xlu0 %1225 }
 0x188   : > { %v4290_v27 = vadd.f32 %v3071_v26, %v2099_v25  ;;  %v3008_v28 = vpop.f32.mrb[8].mxu0  ;;  %v1231_v25 = vpop.permute.xlu1 %1230 }
 0x189   : > { %v3009_v30 = vpop.f32.mrb[9].mxu0 }
 0x18a   : > { %v3010_v32 = vadd.f32 %v3009_v30, %v3008_v28  ;;  %v3011_v33 = vpop.f32.mrb[10].mxu0  ;;  %v3072_v34 = vpop.f32.mrb[8].mxu1 }
 0x18b   : > { %v3012_v35 = vpop.f32.mrb[11].mxu0  ;;  %v3073_v36 = vpop.f32.mrb[9].mxu1 }
 0x18c   : > { %v2104_v37 = vadd.f32 %v3010_v32, %v1196_v29  ;;  %v3013_v38 = vadd.f32 %v3012_v35, %v3011_v33  ;;  %v3074_v39 = vadd.f32 %v3073_v36, %v3072_v34  ;;  %v3075_v40 = vpop.f32.mrb[10].mxu1 }
 0x18d   : > { %v3076_v41 = vpop.f32.mrb[11].mxu1 }
 0x18e   : > { %v4292_v42 = vadd.f32 %v3074_v39, %v2104_v37  ;;  %v2107_v43 = vadd.f32 %v3013_v38, %v1201_v31  ;;  %v3077_v44 = vadd.f32 %v3076_v41, %v3075_v40 }
 0x190   : > { %v4294_v45 = vadd.f32 %v3077_v44, %v2107_v43  ;;  %v3014_v46 = vpop.f32.mrb[12].mxu0  ;;  %v1236_v43 = vpop.permute.xlu0 %1235 }
 0x191   : > { %v3015_v48 = vpop.f32.mrb[13].mxu0 }
 0x192   : > { %v3016_v50 = vadd.f32 %v3015_v48, %v3014_v46  ;;  %v3017_v51 = vpop.f32.mrb[14].mxu0  ;;  %v3078_v52 = vpop.f32.mrb[12].mxu1 }
 0x193   : > { %v3018_v53 = vpop.f32.mrb[15].mxu0  ;;  %v3079_v54 = vpop.f32.mrb[13].mxu1 }
 0x194   : > { %v2112_v55 = vadd.f32 %v3016_v50, %v1206_v47  ;;  %v3019_v56 = vadd.f32 %v3018_v53, %v3017_v51  ;;  %v3080_v57 = vadd.f32 %v3079_v54, %v3078_v52  ;;  %v3081_v58 = vpop.f32.mrb[14].mxu1  ;;  %v1241_v46 = vpop.permute.xlu1 %1240 }
 0x195   : > { %v3082_v59 = vpop.f32.mrb[15].mxu1 }
 0x196   : > { %v4296_v60 = vadd.f32 %v3080_v57, %v2112_v55  ;;  %v2115_v61 = vadd.f32 %v3019_v56, %v1211_v49  ;;  %v3083_v62 = vadd.f32 %v3082_v59, %v3081_v58 }
 0x198   : > { %v4298_v63 = vadd.f32 %v3083_v62, %v2115_v61  ;;  %v3020_v0 = vpop.f32.mrb[16].mxu0 }
 0x199   : > { %v3021_v2 = vpop.f32.mrb[17].mxu0 }
 0x19a   : > { %v3022_v4 = vadd.f32 %v3021_v2, %v3020_v0  ;;  %v3023_v5 = vpop.f32.mrb[18].mxu0  ;;  %v3084_v7 = vpop.f32.mrb[16].mxu1 }
 0x19b   : > { %v3024_v8 = vpop.f32.mrb[19].mxu0  ;;  %v3085_v10 = vpop.f32.mrb[17].mxu1 }
 0x19c   : > { %v2120_v11 = vadd.f32 %v3022_v4, %v1216_v1  ;;  %v3025_v12 = vadd.f32 %v3024_v8, %v3023_v5  ;;  %v3086_v14 = vadd.f32 %v3085_v10, %v3084_v7  ;;  %v3087_v15 = vpop.f32.mrb[18].mxu1  ;;  %v1246_v0 = vpop.permute.xlu0 %1245 }
 0x19d   : > { %v3088_v16 = vpop.f32.mrb[19].mxu1  ;;  %v1251_v2 = vpop.permute.xlu1 %1250 }
 0x19e   : > { %v4300_v17 = vadd.f32 %v3086_v14, %v2120_v11  ;;  %v2123_v18 = vadd.f32 %v3025_v12, %v1221_v3  ;;  %v3089_v19 = vadd.f32 %v3088_v16, %v3087_v15 }
 0x1a0   : > { %v4303_v20 = vadd.f32 %v3089_v19, %v2123_v18  ;;  %v3026_v21 = vpop.f32.mrb[20].mxu0 }
 0x1a1   : > { %v3027_v23 = vpop.f32.mrb[21].mxu0 }
 0x1a2   : > { %v3028_v26 = vadd.f32 %v3027_v23, %v3026_v21  ;;  %v3029_v28 = vpop.f32.mrb[22].mxu0  ;;  %v3090_v29 = vpop.f32.mrb[20].mxu1 }
 0x1a3   : > { %v3030_v30 = vpop.f32.mrb[23].mxu0  ;;  %v3091_v31 = vpop.f32.mrb[21].mxu1 }
 0x1a4   : > { %v2128_v32 = vadd.f32 %v3028_v26, %v1226_v22  ;;  %v3031_v33 = vadd.f32 %v3030_v30, %v3029_v28  ;;  %v3092_v34 = vadd.f32 %v3091_v31, %v3090_v29  ;;  %v3093_v35 = vpop.f32.mrb[22].mxu1 }
 0x1a5   : > { %v3094_v36 = vpop.f32.mrb[23].mxu1 }
 0x1a6   : > { %v4305_v37 = vadd.f32 %v3092_v34, %v2128_v32  ;;  %v2131_v38 = vadd.f32 %v3031_v33, %v1231_v25  ;;  %v3095_v39 = vadd.f32 %v3094_v36, %v3093_v35 }
 0x1a8   : > { %v4307_v40 = vadd.f32 %v3095_v39, %v2131_v38  ;;  %v3032_v41 = vpop.f32.mrb[24].mxu0 }
 0x1a9   : > { %v3033_v44 = vpop.f32.mrb[25].mxu0 }
 0x1aa   : > { %v3034_v47 = vadd.f32 %v3033_v44, %v3032_v41  ;;  %v3035_v48 = vpop.f32.mrb[26].mxu0  ;;  %v3096_v49 = vpop.f32.mrb[24].mxu1 }
 0x1ab   : > { %v3036_v50 = vpop.f32.mrb[27].mxu0  ;;  %v3097_v51 = vpop.f32.mrb[25].mxu1 }
 0x1ac   : > { %v2136_v52 = vadd.f32 %v3034_v47, %v1236_v43  ;;  %v3037_v53 = vadd.f32 %v3036_v50, %v3035_v48  ;;  %v3098_v54 = vadd.f32 %v3097_v51, %v3096_v49  ;;  %v3099_v55 = vpop.f32.mrb[26].mxu1 }
 0x1ad   : > { %v3100_v56 = vpop.f32.mrb[27].mxu1 }
 0x1ae   : > { %v4309_v57 = vadd.f32 %v3098_v54, %v2136_v52  ;;  %v2139_v58 = vadd.f32 %v3037_v53, %v1241_v46  ;;  %v3101_v59 = vadd.f32 %v3100_v56, %v3099_v55 }
 0x1b0   : > { %v4311_v61 = vadd.f32 %v3101_v59, %v2139_v58  ;;  %v3038_v62 = vpop.f32.mrb[28].mxu0 }
 0x1b1   : > { %v3039_v1 = vpop.f32.mrb[29].mxu0 }
 0x1b2   : > { %v3040_v3 = vadd.f32 %v3039_v1, %v3038_v62  ;;  %v3041_v4 = vpop.f32.mrb[30].mxu0  ;;  %v3102_v5 = vpop.f32.mrb[28].mxu1 }
 0x1b3   : > { %v3042_v7 = vpop.f32.mrb[31].mxu0  ;;  %v3103_v8 = vpop.f32.mrb[29].mxu1 }
 0x1b4   : > { %v2144_v10 = vadd.f32 %v3040_v3, %v1246_v0  ;;  %v3043_v11 = vadd.f32 %v3042_v7, %v3041_v4  ;;  %v3104_v12 = vadd.f32 %v3103_v8, %v3102_v5  ;;  %v3105_v14 = vpop.f32.mrb[30].mxu1 }
 0x1b5   : > { %v3106_v15 = vpop.f32.mrb[31].mxu1 }
 0x1b6   : > { %v4313_v16 = vadd.f32 %v3104_v12, %v2144_v10  ;;  %v2147_v18 = vadd.f32 %v3043_v11, %v1251_v2  ;;  %v3107_v19 = vadd.f32 %v3106_v15, %v3105_v14 }
 0x1b8   : > { %v4315_v21 = vadd.f32 %v3107_v19, %v2147_v18  ;;  %v3124_v22 = vpop.f32.mrb[32].mxu0 }
 0x1b9   : > { %v3125_v23 = vpop.f32.mrb[33].mxu0 }
 0x1ba   : > { %v3126_v25 = vadd.f32 %v3125_v23, %v3124_v22  ;;  %v3127_v26 = vpop.f32.mrb[34].mxu0  ;;  %v3188_v28 = vpop.f32.mrb[32].mxu1 }
 0x1bb   : > { %v3128_v29 = vpop.f32.mrb[35].mxu0  ;;  %v3189_v30 = vpop.f32.mrb[33].mxu1 }
 0x1bc   : > { %v2282_v31 = vadd.f32 %v3126_v25, %v4283_v6  ;;  %v3129_v32 = vadd.f32 %v3128_v29, %v3127_v26  ;;  %v3190_v33 = vadd.f32 %v3189_v30, %v3188_v28  ;;  %v3191_v34 = vpop.f32.mrb[34].mxu1 }
 0x1bd   : > { %v3192_v35 = vpop.f32.mrb[35].mxu1 }
 0x1be   : > { %v2285_v36 = vadd.f32 %v3129_v32, %v4285_v9  ;;  %v3193_v38 = vadd.f32 %v3192_v35, %v3191_v34  ;;  %v4319_v39 = vadd.f32 %v3190_v33, %v2282_v31 }
 0x1c0   : > { %v3130_v41 = vpop.f32.mrb[36].mxu0  ;;  %v4321_v43 = vadd.f32 %v3193_v38, %v2285_v36 }
 0x1c1   : > { %v3131_v44 = vpop.f32.mrb[37].mxu0 }
 0x1c2   : > { %v3132_v46 = vadd.f32 %v3131_v44, %v3130_v41  ;;  %v3133_v47 = vpop.f32.mrb[38].mxu0  ;;  %v3194_v48 = vpop.f32.mrb[36].mxu1 }
 0x1c3   : > { %v3134_v49 = vpop.f32.mrb[39].mxu0  ;;  %v3195_v50 = vpop.f32.mrb[37].mxu1 }
 0x1c4   : > { %v2290_v6 = vadd.f32 %v3132_v46, %v4288_v24  ;;  %v3135_v51 = vadd.f32 %v3134_v49, %v3133_v47  ;;  %v3196_v52 = vadd.f32 %v3195_v50, %v3194_v48  ;;  %v3197_v53 = vpop.f32.mrb[38].mxu1 }
 0x1c5   : > { %v3198_v54 = vpop.f32.mrb[39].mxu1 }
 0x1c6   : > { %v2293_v9 = vadd.f32 %v3135_v51, %v4290_v27  ;;  %v3199_v55 = vadd.f32 %v3198_v54, %v3197_v53  ;;  %v4325_v56 = vadd.f32 %v3196_v52, %v2290_v6 }
 0x1c8   : > { %v3136_v58 = vpop.f32.mrb[40].mxu0  ;;  %v4327_v59 = vadd.f32 %v3199_v55, %v2293_v9 }
 0x1c9   : > { %v3137_v62 = vpop.f32.mrb[41].mxu0 }
 0x1ca   : > { %v3138_v0 = vadd.f32 %v3137_v62, %v3136_v58  ;;  %v3139_v1 = vpop.f32.mrb[42].mxu0  ;;  %v3200_v2 = vpop.f32.mrb[40].mxu1 }
 0x1cb   : > { %v3140_v3 = vpop.f32.mrb[43].mxu0  ;;  %v3201_v4 = vpop.f32.mrb[41].mxu1 }
 0x1cc   : > { %v2298_v24 = vadd.f32 %v3138_v0, %v4292_v42  ;;  %v3141_v5 = vadd.f32 %v3140_v3, %v3139_v1  ;;  %v3202_v7 = vadd.f32 %v3201_v4, %v3200_v2  ;;  %v3203_v8 = vpop.f32.mrb[42].mxu1 }
 0x1cd   : > { %v3204_v10 = vpop.f32.mrb[43].mxu1 }
 0x1ce   : > { %v2301_v27 = vadd.f32 %v3141_v5, %v4294_v45  ;;  %v3205_v11 = vadd.f32 %v3204_v10, %v3203_v8  ;;  %v4331_v12 = vadd.f32 %v3202_v7, %v2298_v24 }
 0x1d0   : > { %v3142_v14 = vpop.f32.mrb[44].mxu0  ;;  %v4333_v15 = vadd.f32 %v3205_v11, %v2301_v27 }
 0x1d1   : > { %v3143_v18 = vpop.f32.mrb[45].mxu0 }
 0x1d2   : > { %v3144_v19 = vadd.f32 %v3143_v18, %v3142_v14  ;;  %v3145_v22 = vpop.f32.mrb[46].mxu0  ;;  %v3206_v23 = vpop.f32.mrb[44].mxu1 }
 0x1d3   : > { %v3146_v25 = vpop.f32.mrb[47].mxu0  ;;  %v3207_v26 = vpop.f32.mrb[45].mxu1 }
 0x1d4   : > { %v2306_v42 = vadd.f32 %v3144_v19, %v4296_v60  ;;  %v3147_v28 = vadd.f32 %v3146_v25, %v3145_v22  ;;  %v3208_v29 = vadd.f32 %v3207_v26, %v3206_v23  ;;  %v3209_v30 = vpop.f32.mrb[46].mxu1 }
 0x1d5   : > { %v3210_v31 = vpop.f32.mrb[47].mxu1 }
 0x1d6   : > { %v2309_v45 = vadd.f32 %v3147_v28, %v4298_v63  ;;  %v3211_v32 = vadd.f32 %v3210_v31, %v3209_v30  ;;  %v4337_v33 = vadd.f32 %v3208_v29, %v2306_v42 }
 0x1d8   : > { %v3148_v34 = vpop.f32.mrb[48].mxu0  ;;  %v4339_v35 = vadd.f32 %v3211_v32, %v2309_v45 }
 0x1d9   : > { %v3149_v36 = vpop.f32.mrb[49].mxu0 }
 0x1da   : > { %v3150_v38 = vadd.f32 %v3149_v36, %v3148_v34  ;;  %v3151_v41 = vpop.f32.mrb[50].mxu0  ;;  %v3212_v44 = vpop.f32.mrb[48].mxu1 }
 0x1db   : > { %v3152_v46 = vpop.f32.mrb[51].mxu0  ;;  %v3213_v47 = vpop.f32.mrb[49].mxu1 }
 0x1dc   : > { %v2314_v60 = vadd.f32 %v3150_v38, %v4300_v17  ;;  %v3153_v48 = vadd.f32 %v3152_v46, %v3151_v41  ;;  %v3214_v49 = vadd.f32 %v3213_v47, %v3212_v44  ;;  %v3215_v50 = vpop.f32.mrb[50].mxu1 }
 0x1dd   : > { %v3216_v6 = vpop.f32.mrb[51].mxu1 }
 0x1de   : > { %v2317_v63 = vadd.f32 %v3153_v48, %v4303_v20  ;;  %v3217_v51 = vadd.f32 %v3216_v6, %v3215_v50  ;;  %v4343_v52 = vadd.f32 %v3214_v49, %v2314_v60 }
 0x1e0   : > { %v3154_v53 = vpop.f32.mrb[52].mxu0  ;;  %v4345_v54 = vadd.f32 %v3217_v51, %v2317_v63 }
 0x1e1   : > { %v3155_v9 = vpop.f32.mrb[53].mxu0 }
 0x1e2   : > { %v3156_v55 = vadd.f32 %v3155_v9, %v3154_v53  ;;  %v3157_v58 = vpop.f32.mrb[54].mxu0  ;;  %v3218_v62 = vpop.f32.mrb[52].mxu1 }
 0x1e3   : > { %v3158_v0 = vpop.f32.mrb[55].mxu0  ;;  %v3219_v1 = vpop.f32.mrb[53].mxu1 }
 0x1e4   : > { %v2322_v17 = vadd.f32 %v3156_v55, %v4305_v37  ;;  %v3159_v2 = vadd.f32 %v3158_v0, %v3157_v58  ;;  %v3220_v3 = vadd.f32 %v3219_v1, %v3218_v62  ;;  %v3221_v4 = vpop.f32.mrb[54].mxu1 }
 0x1e5   : > { %v3222_v24 = vpop.f32.mrb[55].mxu1 }
 0x1e6   : > { %v2325_v20 = vadd.f32 %v3159_v2, %v4307_v40  ;;  %v3223_v5 = vadd.f32 %v3222_v24, %v3221_v4  ;;  %v4349_v7 = vadd.f32 %v3220_v3, %v2322_v17 }
 0x1e8   : > { %v3160_v8 = vpop.f32.mrb[56].mxu0  ;;  %v4351_v10 = vadd.f32 %v3223_v5, %v2325_v20 }
 0x1e9   : > { %v3161_v27 = vpop.f32.mrb[57].mxu0 }
 0x1ea   : > { %v3162_v11 = vadd.f32 %v3161_v27, %v3160_v8  ;;  %v3163_v14 = vpop.f32.mrb[58].mxu0  ;;  %v3224_v18 = vpop.f32.mrb[56].mxu1 }
 0x1eb   : > { %v3164_v19 = vpop.f32.mrb[59].mxu0  ;;  %v3225_v22 = vpop.f32.mrb[57].mxu1 }
 0x1ec   : > { %v2330_v37 = vadd.f32 %v3162_v11, %v4309_v57  ;;  %v3165_v23 = vadd.f32 %v3164_v19, %v3163_v14  ;;  %v3226_v25 = vadd.f32 %v3225_v22, %v3224_v18  ;;  %v3227_v26 = vpop.f32.mrb[58].mxu1 }
 0x1ed   : > { %v3228_v42 = vpop.f32.mrb[59].mxu1 }
 0x1ee   : > { %v2333_v40 = vadd.f32 %v3165_v23, %v4311_v61  ;;  %v3229_v28 = vadd.f32 %v3228_v42, %v3227_v26  ;;  %v4355_v29 = vadd.f32 %v3226_v25, %v2330_v37 }
 0x1f0   : > { %v3166_v30 = vpop.f32.mrb[60].mxu0  ;;  %v4357_v31 = vadd.f32 %v3229_v28, %v2333_v40 }
 0x1f1   : > { %v3167_v45 = vpop.f32.mrb[61].mxu0 }
 0x1f2   : > { %v3168_v32 = vadd.f32 %v3167_v45, %v3166_v30  ;;  %v3169_v34 = vpop.f32.mrb[62].mxu0  ;;  %v3230_v36 = vpop.f32.mrb[60].mxu1 }
 0x1f3   : > { %v3170_v38 = vpop.f32.mrb[63].mxu0  ;;  %v3231_v41 = vpop.f32.mrb[61].mxu1 }
 0x1f4   : > { %v2338_v57 = vadd.f32 %v3168_v32, %v4313_v16  ;;  %v3171_v44 = vadd.f32 %v3170_v38, %v3169_v34  ;;  %v3232_v46 = vadd.f32 %v3231_v41, %v3230_v36  ;;  %v3233_v47 = vpop.f32.mrb[62].mxu1 }
 0x1f5   : > { %v3234_v60 = vpop.f32.mrb[63].mxu1 }
 0x1f6   : > { %v2341_v61 = vadd.f32 %v3171_v44, %v4315_v21  ;;  %v3235_v48 = vadd.f32 %v3234_v60, %v3233_v47  ;;  %v2435_v49 = vadd.f32 %v3232_v46, %v2338_v57 }
 0x1f8   : > { %v3279_v50 = vpop.f32.mrb[64].mxu0  ;;  %v2438_v6 = vadd.f32 %v3235_v48, %v2341_v61 }
 0x1f9   : > { %v2484_v63 = vadd.f32 %v3279_v50, %v4325_v56  ;;  %v2475_v51 = vpop.f32.mrb[65].mxu0 }
 0x1fa   : > { %v2476_v53 = vadd.f32 %v2475_v51, %v4319_v39  ;;  %v3280_v9 = vpop.f32.mrb[66].mxu0 }
 0x1fb   : > { %v2487_v55 = vadd.f32 %v3280_v9, %v4327_v59  ;;  %v2478_v58 = vpop.f32.mrb[67].mxu0  ;;  %v2540_v62 = vmax.f32 %v2484_v63, 0.0  ;;  %v2625_v9 = vld [vmem:[%s902_s27 + $0x4] sm:$0x7] }
 0x1fc   : > { %v2479_v16 = vadd.f32 %v2478_v58, %v4321_v43  ;;  %v2538_v1 = vmax.f32 %v2476_v53, 0.0  ;;  %v2626_v53 = vld [vmem:[%s902_s27 + $0x8] sm:$0x7] }
 0x1fd   : > { %v2541_v0 = vmax.f32 %v2487_v55, 0.0  ;;  %v2627_v55 = vld [vmem:[%s902_s27 + $0xc] sm:$0x7] }
 0x1fe   : > { %v2539_v17 = vmax.f32 %v2479_v16, 0.0 }
 0x1ff   : > { %v2557_v21 = vpack.c.bf16 %v2541_v0, %v2540_v62  ;;  %v2629_v62 = vsub.f32 %v2627_v55, %v2625_v9 }
 0x200   : > { %v2556_v2 = vpack.c.bf16 %v2539_v17, %v2538_v1  ;;  %v3283_v3 = vpop.f32.mrb[68].mxu0 }
 0x201   : > { %v2500_v4 = vadd.f32 %v3283_v3, %v4337_v33  ;;  %v2491_v24 = vpop.f32.mrb[69].mxu0  ;;  %v2632_v17 = vmul.f32 0.5, %v2629_v62 }
 0x202   : > { %v2492_v56 = vadd.f32 %v2491_v24, %v4331_v12  ;;  %v3284_v20 = vpop.f32.mrb[70].mxu0  ;;  %3294 = vmatpush3.bf16.msra.mxu1 %v2556_v2 }
 0x203   : > { %v2503_v39 = vadd.f32 %v3284_v20, %v4339_v35  ;;  %v2494_v59 = vpop.f32.mrb[71].mxu0  ;;  %3295 = vmatprep.subr.bf16.mxu1 %v3552_v13  ;;  %v2544_v5 = vmax.f32 %v2500_v4, 0.0  ;;  %v2633_v4 = vadd.f32 %v2632_v17, %v2625_v9  ;;  %v2643_v20 = vrot.slane %v2629_v62, 2 }
 0x204   : > { %v2495_v43 = vadd.f32 %v2494_v59, %v4333_v15  ;;  %v2542_v27 = vmax.f32 %v2492_v56, 0.0 }
 0x205   : > { %v2545_v8 = vmax.f32 %v2503_v39, 0.0  ;;  %v2657_v39 = vrot.slane %v2629_v62, 4 }
 0x206   : > { %v2543_v11 = vmax.f32 %v2495_v43, 0.0  ;;  %3296 = vmatpush3.bf16.msra.mxu1 %v2557_v21 }
 0x207   : > { %v2559_v14 = vpack.c.bf16 %v2545_v8, %v2544_v5  ;;  %3297 = vmatprep.subr.bf16.mxu1 %v3552_v13  ;;  %v2648_v5 = vrot.slane %v2633_v4, 2 }
 0x208   : > { %v2558_v33 = vpack.c.bf16 %v2543_v11, %v2542_v27  ;;  %v3287_v18 = vpop.f32.mrb[72].mxu0 }
 0x209   : > { %v2516_v12 = vadd.f32 %v3287_v18, %v4349_v7  ;;  %v2507_v19 = vpop.f32.mrb[73].mxu0 }
 0x20a   : > { %v2508_v35 = vadd.f32 %v2507_v19, %v4343_v52  ;;  %v3288_v22 = vpop.f32.mrb[74].mxu0  ;;  %3298 = vmatpush3.bf16.msra.mxu1 %v2558_v33 }
 0x20b   : > { %v2519_v37 = vadd.f32 %v3288_v22, %v4351_v10  ;;  %v2510_v15 = vpop.f32.mrb[75].mxu0  ;;  %3299 = vmatprep.subr.bf16.mxu1 %v3552_v13  ;;  %v2548_v25 = vmax.f32 %v2516_v12, 0.0 }
 0x20c   : > { %v2511_v23 = vadd.f32 %v2510_v15, %v4345_v54  ;;  %v2546_v42 = vmax.f32 %v2508_v35, 0.0 }
 0x20d   : > { %v2549_v26 = vmax.f32 %v2519_v37, 0.0 }
 0x20e   : > { %v2547_v40 = vmax.f32 %v2511_v23, 0.0  ;;  %3300 = vmatpush3.bf16.msra.mxu1 %v2559_v14 }
 0x20f   : > { %v2561_v28 = vpack.c.bf16 %v2549_v26, %v2548_v25  ;;  %3301 = vmatprep.subr.bf16.mxu1 %v3552_v13 }
 0x210   : > { %v2560_v7 = vpack.c.bf16 %v2547_v40, %v2546_v42  ;;  %v3291_v30 = vpop.f32.mrb[76].mxu0 }
 0x211   : > { %v2532_v52 = vadd.f32 %v3291_v30, %v2435_v49  ;;  %v2523_v45 = vpop.f32.mrb[77].mxu0  ;;  %v2574_v49 = vpop.permute.xlu1 %2573 }
 0x212   : > { %v2524_v32 = vadd.f32 %v2523_v45, %v4355_v29  ;;  %v3292_v10 = vpop.f32.mrb[78].mxu0  ;;  %3302 = vmatpush3.bf16.msra.mxu1 %v2560_v7  ;;  %v3520_v29 = vld [vmem:[%s4411_s3] sm:$0xff]  }
 0x213   : > { %v2535_v34 = vadd.f32 %v3292_v10, %v2438_v6  ;;  %v2526_v36 = vpop.f32.mrb[79].mxu0  ;;  %3303 = vmatprep.subr.bf16.mxu1 %v3552_v13  ;;  %v2552_v38 = vmax.f32 %v2532_v52, 0.0  ;;  %v2624_v6 = vld [vmem:[%s902_s27] sm:$0x7] }
 0x214   : > { %v2527_v54 = vadd.f32 %v2526_v36, %v4357_v31  ;;  %v2550_v57 = vmax.f32 %v2524_v32, 0.0  ;;  %v2569_v31 = vpop.permute.xlu0 %2568  ;;  %v2628_v16 = vsub.f32 %v2626_v53, %v2624_v6 }
 0x215   : > { %v2553_v41 = vmax.f32 %v2535_v34, 0.0 }
 0x216   : > { %v2551_v44 = vmax.f32 %v2527_v54, 0.0  ;;  %3304 = vmatpush3.bf16.msra.mxu1 %v2561_v28  ;;  %v2630_v1 = vmul.f32 0.5, %v2628_v16  ;;  %v2635_v3 = vrot.slane %v2628_v16, 5  ;;  %v2654_v24 = vrot.slane %v2628_v16, 7 }
 0x217   : > { %v2563_v46 = vpack.c.bf16 %v2553_v41, %v2552_v38  ;;  %3305 = vmatprep.subr.bf16.mxu1 %v3552_v13 }
 0x218   : > { %v2562_v47 = vpack.c.bf16 %v2551_v44, %v2550_v57  ;;  %v2631_v2 = vadd.f32 %v2630_v1, %v2624_v6 }
 0x21a   : > { %3306 = vmatpush3.bf16.msra.mxu1 %v2562_v47  ;;  %v2639_v43 = vrot.slane %v2631_v2, 5 }
 0x21b   : > { %3307 = vmatprep.subr.bf16.mxu1 %v3552_v13 }
 0x21e   : > { %3308 = vmatpush3.bf16.msra.mxu1 %v2563_v46 }
 0x221   : > { %3310 = vmatmul.mubr.bf16.vlgmr.msra.gmra.mrb[64].mxu1 %v3520_v29 }
 0x2f4   : > { %v2616_v60 = vpop.f32.mrb[64].mxu1 }
 0x2f5   : > { %v2617_v61 = vadd.f32 %v2616_v60, %v2569_v31  ;;  %v3311_v48 = vpop.f32.mrb[65].mxu1 }
 0x2f6   : > { %v2619_v50 = vpop.f32.mrb[66].mxu1 }
 0x2f7   : > { %v2975_v63 = vmul.f32 -1.442695, %v2617_v61  ;;  %v2620_v13 = vadd.f32 %v2619_v50, %v2574_v49  ;;  %v3312_v51 = vpop.f32.mrb[67].mxu1  ;;  %v2637_v8 = vmul.f32 %v2635_v3, %v2617_v61  ;;  %v2645_v27 = vmul.f32 %v2643_v20, %v2617_v61 }
 0x2f9   : > { %3521 = vpow2.f32 %v2975_v63  ;;  %v2623_v58 = vmin.f32 %v2620_v13, 4.1351666  ;;  %v2646_v33 = vmul.f32 %v2643_v20, %v2620_v13  ;;  %v2641_v19 = vadd.f32 %v2639_v43, %v2637_v8 }
 0x2fa   : > { %v2650_v35 = vadd.f32 %v2648_v5, %v2645_v27 }
 0x2fb   : > { %v2652_v0 = vmul.f32 1.442695, %v2623_v58  ;;  %v2651_v15 = vadd.f32 %v2648_v5, %v2646_v33 }
 0x2fd   : > { %3523 = vpow2.f32 %v2652_v0 }
 0x303   : > { %v3522_v21 = vpop.eup %3521 }
 0x304   : > { %v2663_v56 = vadd.f32 1.0, %v3522_v21 }
 0x306   : > { %3525 = vrcp.f32 %v2663_v56 }
 0x307   : > { %v3524_v59 = vpop.eup %3523 }
 0x308   : > { %v2656_v11 = vmul.f32 %v3524_v59, %v2654_v24  ;;  %v2659_v14 = vmul.f32 %v3524_v59, %v2657_v39 }
 0x30a   : > { %v2666_v18 = vmul.f32 0.5, %v2656_v11  ;;  %v2671_v12 = vmul.f32 0.5, %v2659_v14 }
 0x30c   : > { %v2668_v22 = vrot.slane %v2666_v18, 6  ;;  %v2673_v37 = vrot.slane %v2671_v12, 6 }
 0x30e   : > { %v2670_v23 = vsub.f32 %v2641_v19, %v2668_v22  ;;  %v2675_v25 = vsub.f32 %v2650_v35, %v2673_v37  ;;  %v2677_v26 = vadd.f32 %v2668_v22, %v2641_v19  ;;  %v2678_v42 = vadd.f32 %v2673_v37, %v2650_v35 }
 0x30f   : > { %v2679_v40 = vadd.f32 %v2673_v37, %v2651_v15  ;;  %v2676_v7 = vsub.f32 %v2651_v15, %v2673_v37 }
 0x310   : > { %v3526_v28 = vpop.eup %3525  ;;  %v2681_v30 = vrot.slane %v2677_v26, 2  ;;  %v2686_v52 = vrot.slane %v2678_v42, 2  ;;  %2707 = sbr.rel (!%p3623_p5) target bundleno = 799 (0x31f), region = 130 }
 0x311   : > { %v2687_v45 = vrot.slane %v2679_v40, 2  ;;  %v2691_v32 = vsel %vm2690_vm1, %v3526_v28, %v2670_v23 }
 0x312   : > { %v2692_v10 = vsel %vm2685_vm2, %v2691_v32, %v2675_v25  ;;  %v2694_v34 = vsel %vm2693_vm3, %v2676_v7, %v2681_v30 }
 0x313   : > { %v2688_v36 = vsel %vm2685_vm2, %v2686_v52, %v2687_v45  ;;  %2699 = vst [vmem:[%s931_s21] sm:$0xff] %v2692_v10 }
 0x314   : > { %v2696_v54 = vsel %vm2695_vm4, %v2694_v34, %v2688_v36 }
 0x315   : > { %v2698_v38 = vsel %vm2697_vm5, %v2696_v54, 0.0 }
 0x316   : > { %2700 = vst [vmem:[%s931_s21 + $0x8] sm:$0xff] %v2698_v38 }
 0x31a   : > { %v2739_v41 = vld [vmem:[%s931_s21] sm:$0xff] }
 0x31b   : > { %2740 = vst [vmem:[%s2709_s8] sm:$0xff] %v2739_v41 }
 0x31d   : > { %v2741_v57 = vld [vmem:[%s931_s21 + $0x8] sm:$0xff] }
 0x31e   : > { %2742 = vst [vmem:[%s2709_s8 + $0x10] sm:$0xff] %v2741_v57 }
 0x31f PF: > { %p13_p10 = scmp.ge.s32.totalorder %s3606_s25, 4   ;;  %s4417_s21 = smov %s3545_s22 }
 0x320   : > { %s4418_s22 = smov %s3617_s28  ;;  %s4419_s23 = smov %s3606_s25 }
 0x321   :  { %15 = sbr.rel (!%p13_p10) target bundleno = 2 (0x2), region = 207 }

</bundles_post_ra>
